<compile_context>
chip_gen: v6e
topology: v6e:2x2x1
jax: 0.10.0
libtpu: 0.0.40
codegen_flags: <defaults>
</compile_context>

<pallas_src>
import jax
import jax.numpy as jnp
from jax.experimental import pallas as pl
from jax.experimental.pallas import tpu as pltpu


def _round_up(x, m):
    return (x + m - 1) // m * m


def _make_supcon_kernel(n_valid: int, temperature: float, base_temperature: float):
    inv_temp = 1.0 / float(temperature)
    scale = -(float(temperature) / float(base_temperature))

    def kernel(feat_row_ref, feat_col_ref, lab_row_ref, lab_col_ref, out_ref,
               m_sc, l_sc, psum_sc, pcnt_sc):
        i = pl.program_id(0)          # anchor-row block
        k = pl.program_id(1)          # contrast-column block (reduction axis)

        @pl.when(k == 0)
        def _init():
            m_sc[...] = jnp.full_like(m_sc, -jnp.inf)
            l_sc[...] = jnp.zeros_like(l_sc)
            psum_sc[...] = jnp.zeros_like(psum_sc)
            pcnt_sc[...] = jnp.zeros_like(pcnt_sc)

        q = feat_row_ref[...]         # [bm, Dp] bf16
        c = feat_col_ref[...]         # [bk, Dp] bf16
        bm = q.shape[0]
        bk = c.shape[0]

        # sim = (Q @ C^T) / temperature on the MXU, f32 accumulation,
        # no explicit transpose (contract dim 1 against dim 1).
        sim = jax.lax.dot_general(
            q, c, (((1,), (1,)), ((), ())),
            preferred_element_type=jnp.float32) * inv_temp          # [bm, bk] f32

        # Rebuild masks in-kernel (no NxN mask HBM traffic).
        rows = i * bm + jax.lax.broadcasted_iota(jnp.int32, (bm, bk), 0)
        cols = k * bk + jax.lax.broadcasted_iota(jnp.int32, (bm, bk), 1)
        col_valid = cols < n_valid                                   # drop padded cols
        not_self = rows != cols                                      # zero diagonal
        same_label = lab_row_ref[...] == lab_col_ref[...]            # [bm,1]==[1,bk] -> [bm,bk]

        logits_mask = jnp.logical_and(not_self, col_valid)
        pos_mask_f = jnp.where(jnp.logical_and(same_label, logits_mask), 1.0, 0.0)

        # Online log-sum-exp over the column axis.
        # Row max includes the self term (matches the PyTorch reference).
        sim_for_max = jnp.where(col_valid, sim, -jnp.inf)
        m_prev = m_sc[...]
        m_new = jnp.maximum(m_prev, jnp.max(sim_for_max, axis=1, keepdims=True))
        alpha = jnp.exp(m_prev - m_new)
        p = jnp.where(logits_mask, jnp.exp(sim - m_new), 0.0)
        l_sc[...] = alpha * l_sc[...] + jnp.sum(p, axis=1, keepdims=True)
        m_sc[...] = m_new

        psum_sc[...] += jnp.sum(pos_mask_f * sim, axis=1, keepdims=True)
        pcnt_sc[...] += jnp.sum(pos_mask_f, axis=1, keepdims=True)

        @pl.when(k == pl.num_programs(1) - 1)
        def _finalize():
            cnt = pcnt_sc[...]
            inv_cnt = pl.reciprocal(jnp.maximum(cnt, 1.0), approx=True)   # EUP divide
            mean_log_prob_pos = psum_sc[...] * inv_cnt - m_sc[...] - jnp.log(l_sc[...])
            loss_rows = scale * mean_log_prob_pos                          # [bm, 1]
            # Guard anchors with no positives (PyTorch would produce NaN here).
            loss_rows = jnp.where(cnt > 0.0, loss_rows, 0.0)
            # Lane-dense unmasked store.
            out_ref[...] = jnp.broadcast_to(loss_rows, out_ref.shape)

    return kernel


def supcon_loss(features, labels, temperature=0.07, base_temperature=0.07):
    """features: [B, V, D] float, labels: [B] int -> scalar f32 loss."""
    B, V, D = features.shape
    N = B * V

    # contrast_feature = cat(unbind(features, dim=1), dim=0)  -> [V*B, D]
    cf = jnp.transpose(features, (1, 0, 2)).reshape(N, D).astype(jnp.float32)
    # Label of row r is labels[r % B]  (view-major stacking).
    lab = jnp.tile(labels.astype(jnp.int32).reshape(-1), (V,))               # [N]

    # Pad to TPU-friendly shapes: D -> multiple of 128, N -> multiple of tile.
    Dp = _round_up(max(D, 128), 128)
    tile = 128 if N <= 128 else 256
    Np = _round_up(N, tile)
    bm = bk = tile

    cf_pad = jnp.zeros((Np, Dp), jnp.float32).at[:N, :D].set(cf)
    cf_bf16 = cf_pad.astype(jnp.bfloat16)        # bf16 MXU operands, f32 accumulate
    lab_pad = jnp.full((Np,), -1, jnp.int32).at[:N].set(lab)
    lab_row = lab_pad.reshape(Np, 1)
    lab_col = lab_pad.reshape(1, Np)

    kernel = _make_supcon_kernel(N, float(temperature), float(base_temperature))

    per_row = pl.pallas_call(
        kernel,
        out_shape=jax.ShapeDtypeStruct((Np, 128), jnp.float32),
        grid_spec=pltpu.PrefetchScalarGridSpec(
            num_scalar_prefetch=0,
            grid=(Np // bm, Np // bk),
            in_specs=[
                pl.BlockSpec((bm, Dp), lambda i, k: (i, 0)),   # anchor rows
                pl.BlockSpec((bk, Dp), lambda i, k: (k, 0)),   # contrast cols
                pl.BlockSpec((bm, 1), lambda i, k: (i, 0)),    # row labels
                pl.BlockSpec((1, bk), lambda i, k: (0, k)),    # col labels
            ],
            out_specs=pl.BlockSpec((bm, 128), lambda i, k: (i, 0)),
            scratch_shapes=[pltpu.VMEM((bm, 1), jnp.float32)] * 4,  # m, l, pos_sum, pos_cnt
        ),
        compiler_params=pltpu.CompilerParams(
            dimension_semantics=("parallel", "arbitrary")),
    )(cf_bf16, cf_bf16, lab_row, lab_col)

    # loss.view(anchor_count, batch).mean() == mean over all N anchor rows.
    return jnp.mean(per_row[:N, 0])


def supcon_loss_ref(features, labels, temperature=0.07, base_temperature=0.07):
    """Pure-JAX f32 reference mirroring the PyTorch forward exactly."""
    B, V, D = features.shape
    N = B * V
    cf = jnp.transpose(features, (1, 0, 2)).reshape(N, D).astype(jnp.float32)
    labels = labels.reshape(-1, 1)
    mask = (labels == labels.T).astype(jnp.float32)
    mask = jnp.tile(mask, (V, V))
    adc = jnp.dot(cf, cf.T) / temperature
    logits = adc - jnp.max(adc, axis=1, keepdims=True)
    logits_mask = 1.0 - jnp.eye(N, dtype=jnp.float32)
    mask = mask * logits_mask
    exp_logits = jnp.exp(logits) * logits_mask
    log_prob = logits - jnp.log(jnp.sum(exp_logits, axis=1, keepdims=True))
    mean_log_prob_pos = jnp.sum(mask * log_prob, axis=1) / jnp.sum(mask, axis=1)
    loss = -(temperature / base_temperature) * mean_log_prob_pos
    return jnp.mean(loss.reshape(V, B))


if __name__ == "__main__":
    key = jax.random.PRNGKey(0)

    B, V, D = 8, 2, 128  # batch, n_views, feature dim (D lane-dense)
    features = jax.random.normal(key, (B, V, D), dtype=jnp.float32)
    # L2-normalize features (standard for SupCon inputs)
    features = features / jnp.linalg.norm(features, axis=-1, keepdims=True)
    # labels with duplicates so every anchor has positives
    labels = jnp.array([0, 1, 2, 3, 0, 1, 2, 3], dtype=jnp.int32)

    loss = jax.block_until_ready(supcon_loss(features, labels))
    ref = jax.block_until_ready(supcon_loss_ref(features, labels))

    assert jnp.isfinite(loss), loss
    # bf16 MXU operands + approx reciprocal -> loosened tolerance vs f32 ref.
    assert jnp.allclose(loss, ref, rtol=2e-2, atol=2e-2), (loss, ref)

    print("KERNEL_OK")
</pallas_src>

<mosaic_0001>
module attributes {stable_mosaic.version = 11 : i64} {
  func.func @kernel(%arg0: i32, %arg1: i32, %arg2: memref<128x128xbf16, #tpu.memory_space<vmem>>, %arg3: memref<128x128xbf16, #tpu.memory_space<vmem>>, %arg4: memref<128x1xi32, #tpu.memory_space<vmem>>, %arg5: memref<1x128xi32, #tpu.memory_space<vmem>>, %arg6: memref<128x128xf32, #tpu.memory_space<vmem>>, %arg7: memref<128x1xf32, #tpu.memory_space<vmem>>, %arg8: memref<128x1xf32, #tpu.memory_space<vmem>>, %arg9: memref<128x1xf32, #tpu.memory_space<vmem>>, %arg10: memref<128x1xf32, #tpu.memory_space<vmem>>) attributes {dimension_semantics = [#tpu.dimension_semantics<parallel>, #tpu.dimension_semantics<arbitrary>], iteration_bounds = array<i64: 1, 1>, scalar_prefetch = 0 : i64, scratch_operands = 4 : i64, tpu.core_type = #tpu.core_type<tc>, window_params = [{transform_indices = @transform_0, window_bounds = array<i64: 128, 128>}, {transform_indices = @transform_1, window_bounds = array<i64: 128, 128>}, {transform_indices = @transform_2, window_bounds = array<i64: 128, 1>}, {transform_indices = @transform_3, window_bounds = array<i64: 1, 128>}, {transform_indices = @transform_4, window_bounds = array<i64: 128, 128>}]} {
    %c0_i32 = arith.constant 0 : i32
    %0 = arith.cmpi eq, %arg1, %c0_i32 : i32
    %1 = arith.extui %0 : i1 to i32
    %c0_i32_0 = arith.constant 0 : i32
    %2 = arith.cmpi ne, %1, %c0_i32_0 : i32
    scf.if %2 {
      %cst_36 = arith.constant 0xFF800000 : f32
      %63 = vector.broadcast %cst_36 : f32 to vector<128x1xf32>
      %c0_37 = arith.constant 0 : index
      %c0_38 = arith.constant 0 : index
      %64 = vector.load %arg7[%c0_37, %c0_38] : memref<128x1xf32, #tpu.memory_space<vmem>>, vector<128x1xf32>
      tpu.vector_store %arg7[%c0_37, %c0_38], %63 {strides = array<i32>} : memref<128x1xf32, #tpu.memory_space<vmem>>, vector<128x1xf32>,
      %cst_39 = arith.constant 0.000000e+00 : f32
      %65 = vector.broadcast %cst_39 : f32 to vector<128x1xf32>
      %c0_40 = arith.constant 0 : index
      %c0_41 = arith.constant 0 : index
      %66 = vector.load %arg8[%c0_40, %c0_41] : memref<128x1xf32, #tpu.memory_space<vmem>>, vector<128x1xf32>
      tpu.vector_store %arg8[%c0_40, %c0_41], %65 {strides = array<i32>} : memref<128x1xf32, #tpu.memory_space<vmem>>, vector<128x1xf32>,
      %cst_42 = arith.constant 0.000000e+00 : f32
      %67 = vector.broadcast %cst_42 : f32 to vector<128x1xf32>
      %c0_43 = arith.constant 0 : index
      %c0_44 = arith.constant 0 : index
      %68 = vector.load %arg9[%c0_43, %c0_44] : memref<128x1xf32, #tpu.memory_space<vmem>>, vector<128x1xf32>
      tpu.vector_store %arg9[%c0_43, %c0_44], %67 {strides = array<i32>} : memref<128x1xf32, #tpu.memory_space<vmem>>, vector<128x1xf32>,
      %cst_45 = arith.constant 0.000000e+00 : f32
      %69 = vector.broadcast %cst_45 : f32 to vector<128x1xf32>
      %c0_46 = arith.constant 0 : index
      %c0_47 = arith.constant 0 : index
      %70 = vector.load %arg10[%c0_46, %c0_47] : memref<128x1xf32, #tpu.memory_space<vmem>>, vector<128x1xf32>
      tpu.vector_store %arg10[%c0_46, %c0_47], %69 {strides = array<i32>} : memref<128x1xf32, #tpu.memory_space<vmem>>, vector<128x1xf32>,
    } else {
    }
    %c0 = arith.constant 0 : index
    %c0_1 = arith.constant 0 : index
    %3 = vector.load %arg2[%c0, %c0_1] : memref<128x128xbf16, #tpu.memory_space<vmem>>, vector<128x128xbf16>
    %c0_2 = arith.constant 0 : index
    %c0_3 = arith.constant 0 : index
    %4 = vector.load %arg3[%c0_2, %c0_3] : memref<128x128xbf16, #tpu.memory_space<vmem>>, vector<128x128xbf16>
    %cst = arith.constant dense<0.000000e+00> : vector<128x128xf32>
    %5 = tpu.matmul %3, %4, %cst {dimension_numbers = #tpu.dot_dimension_numbers<[1], [1], [0], [0], [0, 0, 1, 0], [], []>} : vector<128x128xbf16>, vector<128x128xbf16>, vector<128x128xf32> -> vector<128x128xf32>
    %cst_4 = arith.constant 14.2857141 : f32
    %6 = vector.broadcast %cst_4 : f32 to vector<128x128xf32>
    %7 = arith.mulf %5, %6 : vector<128x128xf32>
    %c128_i32 = arith.constant 128 : i32
    %8 = arith.muli %arg0, %c128_i32 : i32
    %9 = tpu.iota {dimensions = array<i32: 0>} : vector<128x128xi32>
    %10 = vector.broadcast %8 : i32 to vector<128x128xi32>
    %11 = arith.addi %10, %9 : vector<128x128xi32>
    %c128_i32_5 = arith.constant 128 : i32
    %12 = arith.muli %arg1, %c128_i32_5 : i32
    %13 = tpu.iota {dimensions = array<i32: 1>} : vector<128x128xi32>
    %14 = vector.broadcast %12 : i32 to vector<128x128xi32>
    %15 = arith.addi %14, %13 : vector<128x128xi32>
    %c16_i32 = arith.constant 16 : i32
    %16 = vector.broadcast %c16_i32 : i32 to vector<128x128xi32>
    %17 = arith.cmpi slt, %15, %16 : vector<128x128xi32>
    %18 = arith.cmpi ne, %11, %15 : vector<128x128xi32>
    %c0_6 = arith.constant 0 : index
    %c0_7 = arith.constant 0 : index
    %19 = vector.load %arg4[%c0_6, %c0_7] : memref<128x1xi32, #tpu.memory_space<vmem>>, vector<128x1xi32>
    %c0_8 = arith.constant 0 : index
    %c0_9 = arith.constant 0 : index
    %20 = vector.load %arg5[%c0_8, %c0_9] : memref<1x128xi32, #tpu.memory_space<vmem>>, vector<1x128xi32>
    %21 = vector.broadcast %19 : vector<128x1xi32> to vector<128x128xi32>
    %22 = vector.broadcast %20 : vector<1x128xi32> to vector<128x128xi32>
    %23 = arith.cmpi eq, %21, %22 : vector<128x128xi32>
    %24 = arith.andi %18, %17 : vector<128x128xi1>
    %25 = arith.andi %23, %24 : vector<128x128xi1>
    %cst_10 = arith.constant 1.000000e+00 : f32
    %cst_11 = arith.constant 0.000000e+00 : f32
    %26 = vector.broadcast %cst_10 : f32 to vector<128x128xf32>
    %27 = vector.broadcast %cst_11 : f32 to vector<128x128xf32>
    %28 = arith.select %25, %26, %27 : vector<128x128xi1>, vector<128x128xf32>
    %cst_12 = arith.constant 0xFF800000 : f32
    %29 = vector.broadcast %cst_12 : f32 to vector<128x128xf32>
    %30 = arith.select %17, %7, %29 : vector<128x128xi1>, vector<128x128xf32>
    %c0_13 = arith.constant 0 : index
    %c0_14 = arith.constant 0 : index
    %31 = vector.load %arg7[%c0_13, %c0_14] : memref<128x1xf32, #tpu.memory_space<vmem>>, vector<128x1xf32>
    %cst_15 = arith.constant dense<0xFF800000> : vector<128xf32>
    %32 = vector.multi_reduction <maximumf>, %30, %cst_15 [1] : vector<128x128xf32> to vector<128xf32>
    %33 = vector.shape_cast %32 : vector<128xf32> to vector<128x1xf32>
    %34 = arith.maximumf %31, %33 : vector<128x1xf32>
    %35 = arith.subf %31, %34 : vector<128x1xf32>
    %36 = math.exp %35 : vector<128x1xf32>
    %37 = vector.broadcast %34 : vector<128x1xf32> to vector<128x128xf32>
    %38 = arith.subf %7, %37 : vector<128x128xf32>
    %39 = math.exp %38 : vector<128x128xf32>
    %cst_16 = arith.constant 0.000000e+00 : f32
    %40 = vector.broadcast %cst_16 : f32 to vector<128x128xf32>
    %41 = arith.select %24, %39, %40 : vector<128x128xi1>, vector<128x128xf32>
    %c0_17 = arith.constant 0 : index
    %c0_18 = arith.constant 0 : index
    %42 = vector.load %arg8[%c0_17, %c0_18] : memref<128x1xf32, #tpu.memory_space<vmem>>, vector<128x1xf32>
    %43 = arith.mulf %36, %42 : vector<128x1xf32>
    %cst_19 = arith.constant dense<0.000000e+00> : vector<128xf32>
    %44 = vector.multi_reduction <add>, %41, %cst_19 [1] : vector<128x128xf32> to vector<128xf32>
    %45 = vector.shape_cast %44 : vector<128xf32> to vector<128x1xf32>
    %46 = arith.addf %43, %45 : vector<128x1xf32>
    %c0_20 = arith.constant 0 : index
    %c0_21 = arith.constant 0 : index
    %47 = vector.load %arg8[%c0_20, %c0_21] : memref<128x1xf32, #tpu.memory_space<vmem>>, vector<128x1xf32>
    tpu.vector_store %arg8[%c0_20, %c0_21], %46 {strides = array<i32>} : memref<128x1xf32, #tpu.memory_space<vmem>>, vector<128x1xf32>,
    %c0_22 = arith.constant 0 : index
    %c0_23 = arith.constant 0 : index
    %48 = vector.load %arg7[%c0_22, %c0_23] : memref<128x1xf32, #tpu.memory_space<vmem>>, vector<128x1xf32>
    tpu.vector_store %arg7[%c0_22, %c0_23], %34 {strides = array<i32>} : memref<128x1xf32, #tpu.memory_space<vmem>>, vector<128x1xf32>,
    %c0_24 = arith.constant 0 : index
    %c0_25 = arith.constant 0 : index
    %49 = vector.load %arg9[%c0_24, %c0_25] : memref<128x1xf32, #tpu.memory_space<vmem>>, vector<128x1xf32>
    %50 = arith.mulf %28, %7 : vector<128x128xf32>
    %cst_26 = arith.constant dense<0.000000e+00> : vector<128xf32>
    %51 = vector.multi_reduction <add>, %50, %cst_26 [1] : vector<128x128xf32> to vector<128xf32>
    %52 = vector.shape_cast %51 : vector<128xf32> to vector<128x1xf32>
    %53 = arith.addf %49, %52 : vector<128x1xf32>
    %c0_27 = arith.constant 0 : index
    %c0_28 = arith.constant 0 : index
    %54 = vector.load %arg9[%c0_27, %c0_28] : memref<128x1xf32, #tpu.memory_space<vmem>>, vector<128x1xf32>
    tpu.vector_store %arg9[%c0_27, %c0_28], %53 {strides = array<i32>} : memref<128x1xf32, #tpu.memory_space<vmem>>, vector<128x1xf32>,
    %c0_29 = arith.constant 0 : index
    %c0_30 = arith.constant 0 : index
    %55 = vector.load %arg10[%c0_29, %c0_30] : memref<128x1xf32, #tpu.memory_space<vmem>>, vector<128x1xf32>
    %cst_31 = arith.constant dense<0.000000e+00> : vector<128xf32>
    %56 = vector.multi_reduction <add>, %28, %cst_31 [1] : vector<128x128xf32> to vector<128xf32>
    %57 = vector.shape_cast %56 : vector<128xf32> to vector<128x1xf32>
    %58 = arith.addf %55, %57 : vector<128x1xf32>
    %c0_32 = arith.constant 0 : index
    %c0_33 = arith.constant 0 : index
    %59 = vector.load %arg10[%c0_32, %c0_33] : memref<128x1xf32, #tpu.memory_space<vmem>>, vector<128x1xf32>
    tpu.vector_store %arg10[%c0_32, %c0_33], %58 {strides = array<i32>} : memref<128x1xf32, #tpu.memory_space<vmem>>, vector<128x1xf32>,
    %c0_i32_34 = arith.constant 0 : i32
    %60 = arith.cmpi eq, %arg1, %c0_i32_34 : i32
    %61 = arith.extui %60 : i1 to i32
    %c0_i32_35 = arith.constant 0 : i32
    %62 = arith.cmpi ne, %61, %c0_i32_35 : i32
    scf.if %62 {
      %c0_36 = arith.constant 0 : index
      %c0_37 = arith.constant 0 : index
      %63 = vector.load %arg10[%c0_36, %c0_37] : memref<128x1xf32, #tpu.memory_space<vmem>>, vector<128x1xf32>
      %cst_38 = arith.constant 1.000000e+00 : f32
      %64 = vector.broadcast %cst_38 : f32 to vector<128x1xf32>
      %65 = arith.maximumf %63, %64 : vector<128x1xf32>
      %66 = tpu.reciprocal %65 {approx = true} : vector<128x1xf32> -> vector<128x1xf32>
      %c0_39 = arith.constant 0 : index
      %c0_40 = arith.constant 0 : index
      %67 = vector.load %arg9[%c0_39, %c0_40] : memref<128x1xf32, #tpu.memory_space<vmem>>, vector<128x1xf32>
      %68 = arith.mulf %67, %66 : vector<128x1xf32>
      %c0_41 = arith.constant 0 : index
      %c0_42 = arith.constant 0 : index
      %69 = vector.load %arg7[%c0_41, %c0_42] : memref<128x1xf32, #tpu.memory_space<vmem>>, vector<128x1xf32>
      %70 = arith.subf %68, %69 : vector<128x1xf32>
      %c0_43 = arith.constant 0 : index
      %c0_44 = arith.constant 0 : index
      %71 = vector.load %arg8[%c0_43, %c0_44] : memref<128x1xf32, #tpu.memory_space<vmem>>, vector<128x1xf32>
      %72 = math.log %71 : vector<128x1xf32>
      %73 = arith.subf %70, %72 : vector<128x1xf32>
      %cst_45 = arith.constant -1.000000e+00 : f32
      %74 = vector.broadcast %cst_45 : f32 to vector<128x1xf32>
      %75 = arith.mulf %74, %73 : vector<128x1xf32>
      %cst_46 = arith.constant 0.000000e+00 : f32
      %76 = vector.broadcast %cst_46 : f32 to vector<128x1xf32>
      %77 = arith.cmpf ogt, %63, %76 : vector<128x1xf32>
      %cst_47 = arith.constant 0.000000e+00 : f32
      %78 = vector.broadcast %cst_47 : f32 to vector<128x1xf32>
      %79 = arith.select %77, %75, %78 : vector<128x1xi1>, vector<128x1xf32>
      %80 = vector.shape_cast %79 : vector<128x1xf32> to vector<128x1xf32>
      %81 = vector.broadcast %80 : vector<128x1xf32> to vector<128x128xf32>
      %c0_48 = arith.constant 0 : index
      %c0_49 = arith.constant 0 : index
      %82 = vector.load %arg6[%c0_48, %c0_49] : memref<128x128xf32, #tpu.memory_space<vmem>>, vector<128x128xf32>
      tpu.vector_store %arg6[%c0_48, %c0_49], %81 {strides = array<i32>} : memref<128x128xf32, #tpu.memory_space<vmem>>, vector<128x128xf32>,
    } else {
    }
    return
  }
  func.func @transform_0(%arg0: i32, %arg1: i32) -> (i32, i32) {
    %c0_i32 = arith.constant 0 : i32
    %c0_i32_0 = arith.constant 0 : i32
    return %arg0, %c0_i32 : i32, i32
  }
  func.func @transform_1(%arg0: i32, %arg1: i32) -> (i32, i32) {
    %c0_i32 = arith.constant 0 : i32
    %c0_i32_0 = arith.constant 0 : i32
    return %arg1, %c0_i32 : i32, i32
  }
  func.func @transform_2(%arg0: i32, %arg1: i32) -> (i32, i32) {
    %c0_i32 = arith.constant 0 : i32
    %c0_i32_0 = arith.constant 0 : i32
    return %arg0, %c0_i32 : i32, i32
  }
  func.func @transform_3(%arg0: i32, %arg1: i32) -> (i32, i32) {
    %c0_i32 = arith.constant 0 : i32
    %c0_i32_0 = arith.constant 0 : i32
    return %c0_i32, %arg1 : i32, i32
  }
  func.func @transform_4(%arg0: i32, %arg1: i32) -> (i32, i32) {
    %c0_i32 = arith.constant 0 : i32
    %c0_i32_0 = arith.constant 0 : i32
    return %arg0, %c0_i32 : i32, i32
  }
}

</mosaic_0001>

<bundles_post_ra>
// kernel: tpu_custom_call.1
= control target key start
LH: loop header
LB: loop body
LE: loop exit
PB: predicated region body
PF: predicated region fallthrough
CT: control target
= control target key end

     0   :  { %v1674_v2 = vmov 0   ;;  %s2663_s0 = inlined_call_operand.vmem [shape: bf16[128,128], index: 0, kind: input, shape index: {}]   ;;  %s2664_s1 = inlined_call_operand.vmem [shape: bf16[128,128], index: 1, kind: input, shape index: {}]   ;;  %s2665_s2 = inlined_call_operand.vmem [shape: s32[128,1], index: 2, kind: input, shape index: {}]   ;;  %s2666_s3 = inlined_call_operand.vmem [shape: s32[1,128], index: 3, kind: input, shape index: {}]   ;;  %s2667_s4 = inlined_call_operand.hbm [shape: f32[128,128], index: 4, kind: output, shape index: {}]  }
   0x1   :  { %v1508_v0 = vld [vmem:[%s2664_s1 + $0x38] sm:$0xff]   ;;  %v1509_v1 = vld [vmem:[%s2664_s1 + $0x30] sm:$0xff]   ;;  %1507 = vset.pattern.permute.xlu1 %v1674_v2  ;;  %1506 = vset.pattern.permute.xlu0 %v1674_v2  ;;  %v1510_v3 = vld [vmem:[%s2664_s1 + $0x28] sm:$0xff]  }
   0x2   :  { %1452 = vmatprep.subr.bf16.mxu0 %v1508_v0  ;;  %1484 = vmatprep.subr.bf16.mxu1 %v1508_v0  ;;  %v1516_v4 = vld [vmem:[%s2663_s0] sm:$0xff]   ;;  %v388_v7 = vld [vmem:[%s2665_s2 + $0x10] sm:$0xff]  ;;  %v389_v9 = vld [vmem:[%s2665_s2 + $0x18] sm:$0xff] }
   0x3   :  { %1453 = vmatpush3.bf16.xpose.msra.mxu0 %v1508_v0  ;;  %1492 = vmatpush3.bf16.xpose.msra.mxu1 %v1508_v0  ;;  %v1517_v5 = vld [vmem:[%s2663_s0 + $0x20] sm:$0xff]   ;;  %v387_v10 = vld [vmem:[%s2665_s2 + $0x8] sm:$0xff] }
   0x4   :  { %1454 = vmatprep.subr.bf16.mxu0 %v1509_v1  ;;  %1485 = vmatprep.subr.bf16.mxu1 %v1509_v1  ;;  %v1511_v6 = vld [vmem:[%s2664_s1 + $0x20] sm:$0xff]  }
   0x5   :  { %1468 = vmatprep.mubr.bf16.mxu0 %v1516_v4  ;;  %1476 = vmatprep.mubr.bf16.mxu1 %v1517_v5  ;;  %v386_v8 = vld [vmem:[%s2665_s2] sm:$0xff] }
   0x6   :  { %410 = vperm.xlu1 %1507, %v388_v7   ;;  %404 = vperm.xlu0 %1506, %v386_v8  }
   0xb   :  { %1455 = vmatpush3.bf16.xpose.msra.mxu0 %v1509_v1  ;;  %1493 = vmatpush3.bf16.xpose.msra.mxu1 %v1509_v1 }
   0xc   :  { %1456 = vmatprep.subr.bf16.mxu0 %v1510_v3  ;;  %1486 = vmatprep.subr.bf16.mxu1 %v1510_v3 }
  0x13   :  { %1457 = vmatpush3.bf16.xpose.msra.mxu0 %v1510_v3  ;;  %1494 = vmatpush3.bf16.xpose.msra.mxu1 %v1510_v3 }
  0x14   :  { %1458 = vmatprep.subr.bf16.mxu0 %v1511_v6  ;;  %1487 = vmatprep.subr.bf16.mxu1 %v1511_v6 }
  0x15   :  { %9 = vsyncpa [#allocation7], 0  ;;  %413 = vperm.xlu1 %1507, %v389_v9   ;;  %407 = vperm.xlu0 %1506, %v387_v10   ;;  %v391_v11 = vld [vmem:[%s2665_s2 + $0x28] sm:$0xff]  ;;  %v390_v12 = vld [vmem:[%s2665_s2 + $0x20] sm:$0xff]  ;;  %v330_v30 = vlaneseq  ;;  %v2668_v42 = vmov 0.0   ;;  %v2704_v46 = vmov 0 }
  0x16   :  { %v1512_v13 = vld [vmem:[%s2664_s1 + $0x18] sm:$0xff]   ;;  %v392_v15 = vld [vmem:[%s2665_s2 + $0x30] sm:$0xff]  ;;  %v395_v16 = vld [vmem:[%s2665_s2 + $0x48] sm:$0xff]  ;;  %v1676_v7 = vmov -inf  }
  0x17   :  { %v393_v14 = vld [vmem:[%s2665_s2 + $0x38] sm:$0xff]  ;;  %v394_v17 = vld [vmem:[%s2665_s2 + $0x40] sm:$0xff]  ;;  %v1513_v18 = vld [vmem:[%s2664_s1 + $0x10] sm:$0xff]   ;;  %v1792_v31 = vshrl.u32 %v330_v30, 7  ;;  %v1794_v32 = vand.u32 127, %v330_v30 }
  0x18   :  { %v397_v19 = vld [vmem:[%s2665_s2 + $0x58] sm:$0xff]  ;;  %v396_v20 = vld [vmem:[%s2665_s2 + $0x50] sm:$0xff]  ;;  %v399_v21 = vld [vmem:[%s2665_s2 + $0x68] sm:$0xff] }
  0x19   :  { %419 = vperm.xlu1 %1507, %v391_v11   ;;  %416 = vperm.xlu0 %1506, %v390_v12   ;;  %v1514_v22 = vld [vmem:[%s2664_s1 + $0x8] sm:$0xff]   ;;  %v1515_v23 = vld [vmem:[%s2664_s1] sm:$0xff]   ;;  %v1520_v26 = vld [vmem:[%s2663_s0 + $0x10] sm:$0xff]   ;;  %v333_v33 = vadd.s32 16, %v1792_v31  ;;  %v332_v34 = vadd.s32 8, %v1792_v31  ;;  %vm369_vm0 = vcmp.lt.s32.totalorder %v1794_v32, 16  ;;  %vm370_vm1 = vcmp.ne.s32.totalorder %v1792_v31, %v1794_v32 }
  0x1a   :  { %v1518_v24 = vld [vmem:[%s2663_s0 + $0x8] sm:$0xff]   ;;  %v1521_v27 = vld [vmem:[%s2663_s0 + $0x30] sm:$0xff]   ;;  %v1522_v28 = vld [vmem:[%s2663_s0 + $0x18] sm:$0xff]   ;;  %v334_v35 = vadd.s32 24, %v1792_v31  ;;  %v335_v10 = vadd.s32 32, %v1792_v31 }
  0x1b   :  { %1459 = vmatpush3.bf16.xpose.msra.mxu0 %v1511_v6  ;;  %1495 = vmatpush3.bf16.xpose.msra.mxu1 %v1511_v6  ;;  %v1519_v25 = vld [vmem:[%s2663_s0 + $0x28] sm:$0xff]   ;;  %v1523_v29 = vld [vmem:[%s2663_s0 + $0x38] sm:$0xff]   ;;  %vm372_vm2 = vcmp.ne.s32.totalorder %v333_v33, %v1794_v32  ;;  %v1806_v36 = vld [vmem:[%s2666_s3] ss:$0 sm:$0xff]  ;;  %vm371_vm3 = vcmp.ne.s32.totalorder %v332_v34, %v1794_v32 }
  0x1c   :  { %1460 = vmatprep.subr.bf16.mxu0 %v1512_v13  ;;  %1488 = vmatprep.subr.bf16.mxu1 %v1512_v13  ;;  %vm1811_vm4 = vmand %vm370_vm1, %vm369_vm0  ;;  %vm373_vm9 = vcmp.ne.s32.totalorder %v334_v35, %v1794_v32 }
  0x1d   :  { %425 = vperm.xlu1 %1507, %v393_v14   ;;  %422 = vperm.xlu0 %1506, %v392_v15   ;;  %vm1817_vm5 = vmand %vm372_vm2, %vm369_vm0  ;;  %vm2683_vm2 = vcmask 7168  }
  0x1e   :  { %vm1825_vm8 = vmand %vm371_vm3, %vm369_vm0  ;;  %73 = vst.msk [vmem:[#allocation5 + $0x8] sm:$0xff] %vm2683_vm2, %v2668_v42  ;;  %vm374_vm3 = vcmp.ne.s32.totalorder %v335_v10, %v1794_v32 }
  0x1f   :  { %vm1840_vm12 = vmand %vm373_vm9, %vm369_vm0  ;;  %40 = vst.msk [vmem:[#allocation3] sm:$0xff] %vm2683_vm2, %v2668_v42 }
  0x20   :  { %v2705_v46 = vsel %vm1840_vm12, 4294967295, %v2704_v46  ;;  %41 = vst.msk [vmem:[#allocation3 + $0x8] sm:$0xff] %vm2683_vm2, %v2668_v42  ;;  %42 = vst.msk [vmem:[#allocation3 + $0x10] sm:$0xff] %vm2683_vm2, %v2668_v42 }
  0x21   :  { %431 = vperm.xlu1 %1507, %v395_v16   ;;  %428 = vperm.xlu0 %1506, %v394_v17   ;;  %43 = vst.msk [vmem:[#allocation3 + $0x18] sm:$0xff] %vm2683_vm2, %v2668_v42  ;;  %44 = vst.msk [vmem:[#allocation3 + $0x20] sm:$0xff] %vm2683_vm2, %v2668_v42 }
  0x22   :  { %45 = vst.msk [vmem:[#allocation3 + $0x28] sm:$0xff] %vm2683_vm2, %v2668_v42  ;;  %46 = vst.msk [vmem:[#allocation3 + $0x30] sm:$0xff] %vm2683_vm2, %v2668_v42 }
  0x23   :  { %1461 = vmatpush3.bf16.xpose.msra.mxu0 %v1512_v13  ;;  %1496 = vmatpush3.bf16.xpose.msra.mxu1 %v1512_v13  ;;  %47 = vst.msk [vmem:[#allocation3 + $0x38] sm:$0xff] %vm2683_vm2, %v2668_v42  ;;  %48 = vst.msk [vmem:[#allocation3 + $0x40] sm:$0xff] %vm2683_vm2, %v2668_v42 }
  0x24   :  { %1462 = vmatprep.subr.bf16.mxu0 %v1513_v18  ;;  %1489 = vmatprep.subr.bf16.mxu1 %v1513_v18  ;;  %49 = vst.msk [vmem:[#allocation3 + $0x48] sm:$0xff] %vm2683_vm2, %v2668_v42  ;;  %50 = vst.msk [vmem:[#allocation3 + $0x50] sm:$0xff] %vm2683_vm2, %v2668_v42 }
  0x25   :  { %437 = vperm.xlu1 %1507, %v397_v19   ;;  %434 = vperm.xlu0 %1506, %v396_v20   ;;  %51 = vst.msk [vmem:[#allocation3 + $0x58] sm:$0xff] %vm2683_vm2, %v2668_v42  ;;  %52 = vst.msk [vmem:[#allocation3 + $0x60] sm:$0xff] %vm2683_vm2, %v2668_v42 }
  0x26   :  { %53 = vst.msk [vmem:[#allocation3 + $0x68] sm:$0xff] %vm2683_vm2, %v2668_v42  ;;  %54 = vst.msk [vmem:[#allocation3 + $0x70] sm:$0xff] %vm2683_vm2, %v2668_v42 }
  0x27   :  { %55 = vst.msk [vmem:[#allocation3 + $0x78] sm:$0xff] %vm2683_vm2, %v2668_v42  ;;  %56 = vst.msk [vmem:[#allocation4] sm:$0xff] %vm2683_vm2, %v2668_v42 }
  0x28   :  { %57 = vst.msk [vmem:[#allocation4 + $0x8] sm:$0xff] %vm2683_vm2, %v2668_v42  ;;  %58 = vst.msk [vmem:[#allocation4 + $0x10] sm:$0xff] %vm2683_vm2, %v2668_v42 }
  0x29   :  { %443 = vperm.xlu1 %1507, %v399_v21   ;;  %59 = vst.msk [vmem:[#allocation4 + $0x18] sm:$0xff] %vm2683_vm2, %v2668_v42  ;;  %60 = vst.msk [vmem:[#allocation4 + $0x20] sm:$0xff] %vm2683_vm2, %v2668_v42 }
  0x2a   :  { %61 = vst.msk [vmem:[#allocation4 + $0x28] sm:$0xff] %vm2683_vm2, %v2668_v42  ;;  %62 = vst.msk [vmem:[#allocation4 + $0x30] sm:$0xff] %vm2683_vm2, %v2668_v42 }
  0x2b   :  { %1463 = vmatpush3.bf16.xpose.msra.mxu0 %v1513_v18  ;;  %1497 = vmatpush3.bf16.xpose.msra.mxu1 %v1513_v18  ;;  %63 = vst.msk [vmem:[#allocation4 + $0x38] sm:$0xff] %vm2683_vm2, %v2668_v42  ;;  %64 = vst.msk [vmem:[#allocation4 + $0x40] sm:$0xff] %vm2683_vm2, %v2668_v42 }
  0x2c   :  { %1464 = vmatprep.subr.bf16.mxu0 %v1514_v22  ;;  %1490 = vmatprep.subr.bf16.mxu1 %v1514_v22  ;;  %65 = vst.msk [vmem:[#allocation4 + $0x48] sm:$0xff] %vm2683_vm2, %v2668_v42  ;;  %66 = vst.msk [vmem:[#allocation4 + $0x50] sm:$0xff] %vm2683_vm2, %v2668_v42 }
  0x2d   :  { %67 = vst.msk [vmem:[#allocation4 + $0x58] sm:$0xff] %vm2683_vm2, %v2668_v42  ;;  %68 = vst.msk [vmem:[#allocation4 + $0x60] sm:$0xff] %vm2683_vm2, %v2668_v42 }
  0x2e   :  { %69 = vst.msk [vmem:[#allocation4 + $0x68] sm:$0xff] %vm2683_vm2, %v2668_v42  ;;  %70 = vst.msk [vmem:[#allocation4 + $0x70] sm:$0xff] %vm2683_vm2, %v2668_v42 }
  0x2f   :  { %71 = vst.msk [vmem:[#allocation4 + $0x78] sm:$0xff] %vm2683_vm2, %v2668_v42  ;;  %72 = vst.msk [vmem:[#allocation5] sm:$0xff] %vm2683_vm2, %v2668_v42 }
  0x30   :  { %74 = vst.msk [vmem:[#allocation5 + $0x10] sm:$0xff] %vm2683_vm2, %v2668_v42  ;;  %75 = vst.msk [vmem:[#allocation5 + $0x18] sm:$0xff] %vm2683_vm2, %v2668_v42 }
  0x31   :  { %76 = vst.msk [vmem:[#allocation5 + $0x20] sm:$0xff] %vm2683_vm2, %v2668_v42  ;;  %77 = vst.msk [vmem:[#allocation5 + $0x28] sm:$0xff] %vm2683_vm2, %v2668_v42 }
  0x32   :  { %78 = vst.msk [vmem:[#allocation5 + $0x30] sm:$0xff] %vm2683_vm2, %v2668_v42  ;;  %79 = vst.msk [vmem:[#allocation5 + $0x38] sm:$0xff] %vm2683_vm2, %v2668_v42 }
  0x33   :  { %1465 = vmatpush3.bf16.xpose.msra.mxu0 %v1514_v22  ;;  %1498 = vmatpush3.bf16.xpose.msra.mxu1 %v1514_v22  ;;  %80 = vst.msk [vmem:[#allocation5 + $0x40] sm:$0xff] %vm2683_vm2, %v2668_v42  ;;  %81 = vst.msk [vmem:[#allocation5 + $0x48] sm:$0xff] %vm2683_vm2, %v2668_v42 }
  0x34   :  { %1466 = vmatprep.subr.bf16.mxu0 %v1515_v23  ;;  %1491 = vmatprep.subr.bf16.mxu1 %v1515_v23  ;;  %82 = vst.msk [vmem:[#allocation5 + $0x50] sm:$0xff] %vm2683_vm2, %v2668_v42  ;;  %83 = vst.msk [vmem:[#allocation5 + $0x58] sm:$0xff] %vm2683_vm2, %v2668_v42 }
  0x35   :  { %84 = vst.msk [vmem:[#allocation5 + $0x60] sm:$0xff] %vm2683_vm2, %v2668_v42  ;;  %85 = vst.msk [vmem:[#allocation5 + $0x68] sm:$0xff] %vm2683_vm2, %v2668_v42 }
  0x36   :  { %86 = vst.msk [vmem:[#allocation5 + $0x70] sm:$0xff] %vm2683_vm2, %v2668_v42  ;;  %87 = vst.msk [vmem:[#allocation5 + $0x78] sm:$0xff] %vm2683_vm2, %v2668_v42  ;;  %v1000_v34 = vld [vmem:[#allocation5] sm:$0xff] }
  0x37   :  { %34 = vst.msk [vmem:[#allocation2 + $0x50] sm:$0xff] %vm2683_vm2, %v1676_v7  ;;  %24 = vst.msk [vmem:[#allocation2] sm:$0xff] %vm2683_vm2, %v1676_v7 }
  0x38   :  { %25 = vst.msk [vmem:[#allocation2 + $0x8] sm:$0xff] %vm2683_vm2, %v1676_v7  ;;  %26 = vst.msk [vmem:[#allocation2 + $0x10] sm:$0xff] %vm2683_vm2, %v1676_v7 }
  0x39   :  { %27 = vst.msk [vmem:[#allocation2 + $0x18] sm:$0xff] %vm2683_vm2, %v1676_v7  ;;  %28 = vst.msk [vmem:[#allocation2 + $0x20] sm:$0xff] %vm2683_vm2, %v1676_v7 }
  0x3a   :  { %29 = vst.msk [vmem:[#allocation2 + $0x28] sm:$0xff] %vm2683_vm2, %v1676_v7  ;;  %30 = vst.msk [vmem:[#allocation2 + $0x30] sm:$0xff] %vm2683_vm2, %v1676_v7 }
  0x3b   :  { %1467 = vmatpush3.bf16.xpose.msra.mxu0 %v1515_v23  ;;  %1499 = vmatpush3.bf16.xpose.msra.mxu1 %v1515_v23  ;;  %31 = vst.msk [vmem:[#allocation2 + $0x38] sm:$0xff] %vm2683_vm2, %v1676_v7  ;;  %32 = vst.msk [vmem:[#allocation2 + $0x40] sm:$0xff] %vm2683_vm2, %v1676_v7 }
  0x3c   :  { %33 = vst.msk [vmem:[#allocation2 + $0x48] sm:$0xff] %vm2683_vm2, %v1676_v7  ;;  %35 = vst.msk [vmem:[#allocation2 + $0x58] sm:$0xff] %vm2683_vm2, %v1676_v7 }
  0x3d   :  { %36 = vst.msk [vmem:[#allocation2 + $0x60] sm:$0xff] %vm2683_vm2, %v1676_v7  ;;  %37 = vst.msk [vmem:[#allocation2 + $0x68] sm:$0xff] %vm2683_vm2, %v1676_v7 }
  0x3e   :  { %38 = vst.msk [vmem:[#allocation2 + $0x70] sm:$0xff] %vm2683_vm2, %v1676_v7  ;;  %39 = vst.msk [vmem:[#allocation2 + $0x78] sm:$0xff] %vm2683_vm2, %v1676_v7 }
  0x42   :  { %1469 = vmatmul.mubr.bf16.vlgmr.msra.gmra.mxu0 %v1518_v24  ;;  %1477 = vmatmul.mubr.bf16.vlgmr.msra.gmra.mxu1 %v1519_v25  ;;  %v2706_v25 = vmov 0 }
  0x43   :  { %1472 = vmatprep.mubr.bf16.mxu0 %v1520_v26  ;;  %1480 = vmatprep.mubr.bf16.mxu1 %v1521_v27 }
  0x4a   :  { %1473 = vmatmul.mubr.bf16.gmra.mxu0 %v1522_v28  ;;  %1481 = vmatmul.mubr.bf16.gmra.mxu1 %v1523_v29 }
  0x81   :  { %v411_v38 = vpop.permute.xlu1 %410  ;;  %v405_v39 = vpop.permute.xlu0 %404 }
  0x82   :  { %vm457_vm6 = vcmp.eq.s32.totalorder %v411_v38, %v1806_v36  ;;  %vm455_vm7 = vcmp.eq.s32.totalorder %v405_v39, %v1806_v36 }
  0x83   :  { %vm487_vm10 = vmand %vm455_vm7, %vm1811_vm4 }
  0x84   :  { %v1833_v43 = vsel %vm487_vm10, 1.0, %v2668_v42  ;;  %vm489_vm11 = vmand %vm457_vm6, %vm1817_vm5 }
  0x85   :  { %1016 = vadd.xlane.f32.xlu0 %v1833_v43  ;;  %v1847_v47 = vsel %vm489_vm11, 1.0, %v2668_v42  ;;  %vm2041_vm7 = vmand %vm374_vm3, %vm369_vm0 }
  0x86   :  { %v2707_v25 = vsel %vm2041_vm7, 4294967295, %v2706_v25 }
  0x89   :  { %1020 = vadd.xlane.f32.xlu0 %v1847_v47 }
  0x90   :  { %v414_v44 = vpop.permute.xlu1 %413  ;;  %v408_v45 = vpop.permute.xlu0 %407 }
  0x91   :  { %vm458_vm13 = vcmp.eq.s32.totalorder %v414_v44, %v1806_v36  ;;  %vm456_vm14 = vcmp.eq.s32.totalorder %v408_v45, %v1806_v36 }
  0x92   :  { %vm488_vm15 = vmand %vm456_vm14, %vm1825_vm8 }
  0x93   :  { %v1852_v48 = vsel %vm488_vm15, 1.0, %v2668_v42  ;;  %vm490_vm1 = vmand %vm458_vm13, %vm1840_vm12 }
  0x94   :  { %1018 = vadd.xlane.f32.xlu1 %v1852_v48  ;;  %v1859_v49 = vsel %vm490_vm1, 1.0, %v2668_v42  ;;  %v1958_v50 = vpop.permute.xlu1 %419  ;;  %v1960_v53 = vpop.permute.xlu0 %416 }
  0x95   :  { %vm459_vm6 = vcmp.eq.s32.totalorder %v1960_v53, %v1806_v36  ;;  %v1001_v53 = vld [vmem:[#allocation5 + $0x8] sm:$0xff] }
  0x96   :  { %vm491_vm9 = vmand %vm459_vm6, %vm2041_vm7 }
  0x97   :  { %v2062_v39 = vsel %vm491_vm9, 1.0, %v2668_v42 }
  0x98   :  { %1022 = vadd.xlane.f32.xlu1 %v1859_v49  ;;  %v1976_v0 = vpop.permute.xlu1 %425  ;;  %v1981_v3 = vpop.permute.xlu0 %422 }
  0x99   :  { %vm461_vm11 = vcmp.eq.s32.totalorder %v1981_v3, %v1806_v36 }
  0x9c   :  { %v2007_v11 = vpop.permute.xlu1 %431  ;;  %v2017_v16 = vpop.permute.xlu0 %428 }
  0x9d   :  { %vm463_vm1 = vcmp.eq.s32.totalorder %v2017_v16, %v1806_v36 }
  0xa0   :  { %v2032_v22 = vpop.permute.xlu1 %437  ;;  %v2045_v26 = vpop.permute.xlu0 %434 }
  0xa4   :  { %v2059_v38 = vpop.permute.xlu1 %443 }
 0x102   :  { %v1470_v51 = vpop.f32.mrf.mxu0  ;;  %v1478_v52 = vpop.f32.mrf.mxu1 }
 0x103   :  { %v1962_v54 = vmul.f32 14.285714, %v1470_v51  ;;  %v1964_v55 = vmul.f32 14.285714, %v1478_v52 }
 0x104   :  { %v250_v56 = vpop.f32.mrf.mxu0  ;;  %v282_v57 = vpop.f32.mrf.mxu1 }
 0x105   :  { %v1966_v58 = vmul.f32 14.285714, %v250_v56  ;;  %v1968_v59 = vmul.f32 14.285714, %v282_v57  ;;  %v529_v60 = vsel %vm369_vm0, %v1964_v55, -inf  ;;  %v521_v61 = vsel %vm369_vm0, %v1962_v54, -inf }
 0x106   :  { %v1471_v62 = vpop.f32.mrf.mxu0  ;;  %v1479_v63 = vpop.f32.mrf.mxu1  ;;  %571 = vmax.xlane.f32.xlu1 %v529_v60  ;;  %555 = vmax.xlane.f32.xlu0 %v521_v61  ;;  %v1002_v56 = vld [vmem:[#allocation5 + $0x10] sm:$0xff] }
 0x107   :  { %v527_v1 = vsel %vm369_vm0, %v1968_v59, -inf  ;;  %v1983_v4 = vmul.f32 14.285714, %v1471_v62  ;;  %v519_v6 = vsel %vm369_vm0, %v1966_v58, -inf  ;;  %v2019_v17 = vmul.f32 14.285714, %v1479_v63 }
 0x108   :  { %v253_v2 = vpop.f32.mrf.mxu0  ;;  %v285_v8 = vpop.f32.mrf.mxu1 }
 0x109   :  { %v1985_v5 = vmul.f32 14.285714, %v253_v2  ;;  %v522_v14 = vsel %vm369_vm0, %v1983_v4, -inf  ;;  %v530_v20 = vsel %vm369_vm0, %v2019_v17, -inf  ;;  %v2034_v23 = vmul.f32 14.285714, %v285_v8 }
 0x10a   :  { %v1474_v9 = vpop.f32.mrf.mxu0  ;;  %567 = vmax.xlane.f32.xlu1 %v527_v1  ;;  %551 = vmax.xlane.f32.xlu0 %v519_v6  ;;  %v1482_v15 = vpop.f32.mrf.mxu1  ;;  %v1003_v6 = vld [vmem:[#allocation5 + $0x18] sm:$0xff] }
 0x10b   :  { %v2009_v12 = vmul.f32 14.285714, %v1474_v9  ;;  %v520_v13 = vsel %vm369_vm0, %v1985_v5, -inf  ;;  %v2021_v18 = vmul.f32 14.285714, %v1482_v15  ;;  %v528_v28 = vsel %vm369_vm0, %v2034_v23, -inf }
 0x10c   :  { %v266_v21 = vpop.f32.mrf.mxu0  ;;  %v298_v29 = vpop.f32.mrf.mxu1 }
 0x10d   :  { %v525_v19 = vsel %vm369_vm0, %v2009_v12, -inf  ;;  %v533_v24 = vsel %vm369_vm0, %v2021_v18, -inf  ;;  %v2047_v27 = vmul.f32 14.285714, %v266_v21  ;;  %v2054_v30 = vmul.f32 14.285714, %v298_v29 }
 0x10e   :  { %553 = vmax.xlane.f32.xlu1 %v520_v13  ;;  %557 = vmax.xlane.f32.xlu0 %v522_v14  ;;  %v1475_v35 = vpop.f32.mrf.mxu0  ;;  %v1017_v44 = vpop.xlane.xlu0 %1016  ;;  %v401_v21 = vld [vmem:[%s2665_s2 + $0x78] sm:$0xff]  ;;  %v2101_v29 = vld [vmem:[#allocation2 + $0x50] sm:$0xff] }
 0x10f   :  { %v523_v33 = vsel %vm369_vm0, %v2047_v27, -inf  ;;  %v1048_v45 = vadd.f32 %v1017_v44, %v1000_v34  ;;  %v2065_v51 = vmul.f32 14.285714, %v1475_v35  ;;  %v531_v52 = vsel %vm369_vm0, %v2054_v30, -inf  ;;  %v1483_v57 = vpop.f32.mrf.mxu1 }
 0x110   :  { %v2071_v60 = vmul.f32 14.285714, %v1483_v57  ;;  %v269_v7 = vpop.f32.mrf.mxu0  ;;  %v1004_v57 = vld [vmem:[#allocation5 + $0x20] sm:$0xff] }
 0x111   :  { %1064 = vst.msk [vmem:[#allocation5] sm:$0xff] %vm2683_vm2, %v1048_v45  ;;  %v526_v61 = vsel %vm369_vm0, %v2065_v51, -inf  ;;  %v2081_v13 = vmul.f32 14.285714, %v269_v7  ;;  %v301_v14 = vpop.f32.mrf.mxu1  ;;  %v2191_v7 = vld [vmem:[#allocation2 + $0x20] sm:$0xff] }
 0x112   :  { %563 = vmax.xlane.f32.xlu1 %v525_v19  ;;  %573 = vmax.xlane.f32.xlu0 %v530_v20  ;;  %v1021_v63 = vpop.xlane.xlu0 %1020  ;;  %v534_v8 = vsel %vm369_vm0, %v2071_v60, -inf  ;;  %v2087_v19 = vmul.f32 14.285714, %v301_v14  ;;  %2717 = vst [vmem:[#allocation18_spill] sm:$0xff] %v2191_v7 }
 0x113   :  { %v1050_v2 = vadd.f32 %v1021_v63, %v1002_v56  ;;  %v524_v15 = vsel %vm369_vm0, %v2081_v13, -inf }
 0x114   :  { %v532_v20 = vsel %vm369_vm0, %v2087_v19, -inf }
 0x115   :  { %1066 = vst.msk [vmem:[#allocation5 + $0x10] sm:$0xff] %vm2683_vm2, %v1050_v2  ;;  %v2131_v2 = vld [vmem:[#allocation2 + $0x8] sm:$0xff] }
 0x116   :  { %579 = vmax.xlane.f32.xlu1 %v533_v24  ;;  %569 = vmax.xlane.f32.xlu0 %v528_v28  ;;  %v398_v24 = vld [vmem:[%s2665_s2 + $0x60] sm:$0xff]  ;;  %v400_v28 = vld [vmem:[%s2665_s2 + $0x70] sm:$0xff]  ;;  %s1677_s2 = smov [#allocation6]  }
 0x117   :  { %s1408_s26 = sshll.u32 %s1677_s2, 4  ;;  %s1409_s26 = int_to_ptr.vmem [resolvable:$true] %s1408_s26 }
 0x118   :  { %s1652_s27 = scalar_lea.vmem %s1409_s26, 2048  ;;  %p1657_p1 = scmp.lt.s32.totalorder %s1409_s26, %s1409_s26 }
 0x119   :  { %p1653_p0 = scmp.ne.s32.totalorder %s1409_s26, %s1652_s27  ;;  %p1658_p2 = scmp.lt.s32.totalorder %s1652_s27, %s1652_s27 }
 0x11a   :  { %559 = vmax.xlane.f32.xlu1 %v523_v33  ;;  %1024 = vadd.xlane.f32.xlu0 %v2062_v39  ;;  %v2103_v33 = vld [vmem:[#allocation2 + $0x10] sm:$0xff] }
 0x11b   :  { %p1659_p3 = por %p1658_p2, %p1657_p1 }
 0x11d   :  { %v1019_v62 = vpop.xlane.xlu1 %1018  ;;  %p1660_p4 = pnand %p1659_p3, %p1653_p0 }
 0x11e   :  { %575 = vmax.xlane.f32.xlu1 %v531_v52  ;;  %565 = vmax.xlane.f32.xlu0 %v526_v61  ;;  %v1049_v1 = vadd.f32 %v1019_v62, %v1001_v53  ;;  %v2111_v52 = vld [vmem:[#allocation2 + $0x40] sm:$0xff] }
 0x11f   :  { %v2113_v53 = vld [vmem:[#allocation2] sm:$0xff] }
 0x120   :  { %1065 = vst.msk [vmem:[#allocation5 + $0x8] sm:$0xff] %vm2683_vm2, %v1049_v1 }
 0x121   :  { %v1023_v9 = vpop.xlane.xlu1 %1022 }
 0x122   :  { %581 = vmax.xlane.f32.xlu0 %v534_v8  ;;  %v1051_v10 = vadd.f32 %v1023_v9, %v1003_v6  ;;  %v2133_v6 = vld [vmem:[#allocation2 + $0x18] sm:$0xff] }
 0x124   :  { %1067 = vst.msk [vmem:[#allocation5 + $0x18] sm:$0xff] %vm2683_vm2, %v1051_v10 }
 0x126   :  { %561 = vmax.xlane.f32.xlu0 %v524_v15 }
 0x12a   :  { %577 = vmax.xlane.f32.xlu0 %v532_v20  ;;  %v2151_v20 = vld [vmem:[#allocation2 + $0x30] sm:$0xff] }
 0x12b   :  { %2709 = vst [vmem:[#allocation10_spill] sm:$0xff] %v2151_v20 }
 0x12f   :  { %449 = vperm.xlu1 %1507, %v401_v21   ;;  %v2153_v21 = vld [vmem:[#allocation2 + $0x58] sm:$0xff] }
 0x130   :  { %2710 = vst [vmem:[#allocation11_spill] sm:$0xff] %v2153_v21 }
 0x140   :  { %440 = vperm.xlu0 %1506, %v398_v24   ;;  %v2206_v24 = vld [vmem:[#allocation2 + $0x60] sm:$0xff] }
 0x141   :  { %2719 = vst [vmem:[#allocation20_spill] sm:$0xff] %v2206_v24 }
 0x144   :  { %446 = vperm.xlu0 %1506, %v400_v28  }
 0x18f   :  { %v572_v34 = vpop.xlane.xlu1 %571  ;;  %v556_v35 = vpop.xlane.xlu0 %555 }
 0x190   :  { %v2106_v44 = vmax.f32 %v2101_v29, %v572_v34  ;;  %v2109_v45 = vmax.f32 %v2103_v33, %v556_v35 }
 0x192   :  { %898 = vst.msk [vmem:[#allocation2 + $0x50] sm:$0xff] %vm2683_vm2, %v2106_v44  ;;  %890 = vst.msk [vmem:[#allocation2 + $0x10] sm:$0xff] %vm2683_vm2, %v2109_v45  ;;  %699 = vperm.xlu0 %1506, %v2106_v44   ;;  %659 = vperm.xlu1 %1507, %v2109_v45  }
 0x193   :  { %v568_v61 = vpop.xlane.xlu1 %567  ;;  %v552_v62 = vpop.xlane.xlu0 %551 }
 0x194   :  { %v2126_v63 = vmax.f32 %v2111_v52, %v568_v61  ;;  %v2129_v1 = vmax.f32 %v2113_v53, %v552_v62 }
 0x196   :  { %896 = vst.msk [vmem:[#allocation2 + $0x40] sm:$0xff] %vm2683_vm2, %v2126_v63  ;;  %888 = vst.msk [vmem:[#allocation2] sm:$0xff] %vm2683_vm2, %v2129_v1  ;;  %689 = vperm.xlu0 %1506, %v2126_v63   ;;  %649 = vperm.xlu1 %1507, %v2129_v1  }
 0x197   :  { %v554_v9 = vpop.xlane.xlu1 %553  ;;  %v558_v10 = vpop.xlane.xlu0 %557 }
 0x198   :  { %v2146_v14 = vmax.f32 %v2131_v2, %v554_v9  ;;  %v2149_v15 = vmax.f32 %v2133_v6, %v558_v10  ;;  %v2171_v9 = vld [vmem:[#allocation2 + $0x70] sm:$0xff]  ;;  %v2173_v10 = vld [vmem:[#allocation2 + $0x48] sm:$0xff] }
 0x199   :  { %2713 = vst [vmem:[#allocation14_spill] sm:$0xff] %v2171_v9  ;;  %2714 = vst [vmem:[#allocation15_spill] sm:$0xff] %v2173_v10 }
 0x19a   :  { %2708 = vst [vmem:[#allocation9_spill] sm:$0xff] %v2149_v15  ;;  %889 = vst.msk [vmem:[#allocation2 + $0x8] sm:$0xff] %vm2683_vm2, %v2146_v14  ;;  %654 = vperm.xlu0 %1506, %v2146_v14   ;;  %664 = vperm.xlu1 %1507, %v2149_v15  }
 0x19b   :  { %891 = vst.msk [vmem:[#allocation2 + $0x18] sm:$0xff] %vm2683_vm2, %v2149_v15  ;;  %v564_v34 = vpop.xlane.xlu1 %563  ;;  %v574_v35 = vpop.xlane.xlu0 %573 }
 0x19c   :  { %v2166_v61 = vmax.f32 %v2151_v20, %v564_v34  ;;  %v2169_v62 = vmax.f32 %v2153_v21, %v574_v35  ;;  %v344_v21 = vadd.s32 104, %v1792_v31 }
 0x19e   :  { %2711 = vst [vmem:[#allocation12_spill] sm:$0xff] %v2166_v61  ;;  %2712 = vst [vmem:[#allocation13_spill] sm:$0xff] %v2169_v62  ;;  %679 = vperm.xlu0 %1506, %v2166_v61   ;;  %704 = vperm.xlu1 %1507, %v2169_v62  }
 0x19f   :  { %894 = vst.msk [vmem:[#allocation2 + $0x30] sm:$0xff] %vm2683_vm2, %v2166_v61  ;;  %899 = vst.msk [vmem:[#allocation2 + $0x58] sm:$0xff] %vm2683_vm2, %v2169_v62  ;;  %v580_v34 = vpop.xlane.xlu1 %579  ;;  %v570_v35 = vpop.xlane.xlu0 %569 }
 0x1a0   :  { %v2186_v8 = vmax.f32 %v2171_v9, %v580_v34  ;;  %v2189_v28 = vmax.f32 %v2173_v10, %v570_v35  ;;  %v2208_v9 = vld [vmem:[#allocation2 + $0x38] sm:$0xff] }
 0x1a1   :  { %2720 = vst [vmem:[#allocation21_spill] sm:$0xff] %v2208_v9 }
 0x1a2   :  { %2715 = vst [vmem:[#allocation16_spill] sm:$0xff] %v2186_v8  ;;  %2716 = vst [vmem:[#allocation17_spill] sm:$0xff] %v2189_v28  ;;  %719 = vperm.xlu0 %1506, %v2186_v8   ;;  %694 = vperm.xlu1 %1507, %v2189_v28  }
 0x1a3   :  { %902 = vst.msk [vmem:[#allocation2 + $0x70] sm:$0xff] %vm2683_vm2, %v2186_v8  ;;  %897 = vst.msk [vmem:[#allocation2 + $0x48] sm:$0xff] %vm2683_vm2, %v2189_v28  ;;  %v560_v34 = vpop.xlane.xlu1 %559  ;;  %v1025_v35 = vpop.xlane.xlu0 %1024 }
 0x1a4   :  { %v2204_v42 = vmax.f32 %v2191_v7, %v560_v34  ;;  %v1052_v62 = vadd.f32 %v1025_v35, %v1004_v57  ;;  %v2222_v35 = vld [vmem:[#allocation2 + $0x78] sm:$0xff]  ;;  %v342_v7 = vadd.s32 88, %v1792_v31 }
 0x1a5   :  { %2723 = vst [vmem:[#allocation24_spill] sm:$0xff] %v2222_v35 }
 0x1a6   :  { %2718 = vst [vmem:[#allocation19_spill] sm:$0xff] %v2204_v42  ;;  %892 = vst.msk [vmem:[#allocation2 + $0x20] sm:$0xff] %vm2683_vm2, %v2204_v42  ;;  %669 = vperm.xlu0 %1506, %v2204_v42   ;;  %v2237_v42 = vld [vmem:[#allocation2 + $0x28] sm:$0xff] }
 0x1a7   :  { %1068 = vst.msk [vmem:[#allocation5 + $0x20] sm:$0xff] %vm2683_vm2, %v1052_v62  ;;  %v576_v28 = vpop.xlane.xlu1 %575  ;;  %v566_v10 = vpop.xlane.xlu0 %565  ;;  %2725 = vst [vmem:[#allocation26_spill] sm:$0xff] %v2237_v42 }
 0x1a8   :  { %v2217_v34 = vmax.f32 %v2206_v24, %v576_v28  ;;  %v2220_v57 = vmax.f32 %v2208_v9, %v566_v10  ;;  %v338_v24 = vadd.s32 56, %v1792_v31 }
 0x1aa   :  { %2721 = vst [vmem:[#allocation22_spill] sm:$0xff] %v2217_v34  ;;  %2722 = vst [vmem:[#allocation23_spill] sm:$0xff] %v2220_v57  ;;  %709 = vperm.xlu0 %1506, %v2217_v34   ;;  %684 = vperm.xlu1 %1507, %v2220_v57  }
 0x1ab   :  { %900 = vst.msk [vmem:[#allocation2 + $0x60] sm:$0xff] %vm2683_vm2, %v2217_v34  ;;  %895 = vst.msk [vmem:[#allocation2 + $0x38] sm:$0xff] %vm2683_vm2, %v2220_v57  ;;  %v582_v28 = vpop.xlane.xlu0 %581  ;;  %v2247_v34 = vld [vmem:[#allocation2 + $0x68] sm:$0xff] }
 0x1ac   :  { %v2235_v10 = vmax.f32 %v2222_v35, %v582_v28  ;;  %2727 = vst [vmem:[#allocation28_spill] sm:$0xff] %v2247_v34  ;;  %v339_v28 = vadd.s32 64, %v1792_v31 }
 0x1ae   :  { %2724 = vst [vmem:[#allocation25_spill] sm:$0xff] %v2235_v10  ;;  %903 = vst.msk [vmem:[#allocation2 + $0x78] sm:$0xff] %vm2683_vm2, %v2235_v10  ;;  %724 = vperm.xlu1 %1507, %v2235_v10   ;;  %vm378_vm14 = vcmp.ne.s32.totalorder %v339_v28, %v1794_v32  ;;  %v341_v10 = vadd.s32 80, %v1792_v31 }
 0x1af   :  { %v562_v62 = vpop.xlane.xlu0 %561  ;;  %vm2281_vm3 = vmand %vm378_vm14, %vm369_vm0 }
 0x1b0   :  { %v2245_v9 = vmax.f32 %v2237_v42, %v562_v62  ;;  %v337_v62 = vadd.s32 48, %v1792_v31  ;;  %vm380_vm6 = vcmp.ne.s32.totalorder %v341_v10, %v1794_v32  ;;  %vm495_vm9 = vmand %vm463_vm1, %vm2281_vm3  ;;  %v345_v10 = vadd.s32 112, %v1792_v31 }
 0x1b1   :  { %v336_v42 = vadd.s32 40, %v1792_v31 }
 0x1b2   :  { %2726 = vst [vmem:[#allocation27_spill] sm:$0xff] %v2245_v9  ;;  %893 = vst.msk [vmem:[#allocation2 + $0x28] sm:$0xff] %vm2683_vm2, %v2245_v9  ;;  %674 = vperm.xlu1 %1507, %v2245_v9   ;;  %vm376_vm10 = vcmp.ne.s32.totalorder %v337_v62, %v1794_v32  ;;  %v343_v62 = vadd.s32 96, %v1792_v31 }
 0x1b3   :  { %v578_v56 = vpop.xlane.xlu0 %577  ;;  %vm2269_vm13 = vmand %vm376_vm10, %vm369_vm0  ;;  %vm465_vm10 = vcmp.eq.s32.totalorder %v2045_v26, %v1806_v36  ;;  %v2736_v26 = vmov 0 }
 0x1b4   :  { %v2255_v35 = vmax.f32 %v2247_v34, %v578_v56  ;;  %v2729_v56 = vmov 0  ;;  %vm493_vm15 = vmand %vm461_vm11, %vm2269_vm13  ;;  %vm382_vm14 = vcmp.ne.s32.totalorder %v343_v62, %v1794_v32 }
 0x1b5   :  { %v2730_v56 = vsel %vm2269_vm13, 4294967295, %v2729_v56  ;;  %vm2297_vm11 = vmand %vm380_vm6, %vm369_vm0 }
 0x1b6   :  { %2728 = vst [vmem:[#allocation29_spill] sm:$0xff] %v2255_v35  ;;  %901 = vst.msk [vmem:[#allocation2 + $0x68] sm:$0xff] %vm2683_vm2, %v2255_v35  ;;  %714 = vperm.xlu1 %1507, %v2255_v35   ;;  %v2733_v35 = vmov 0.0   ;;  %vm384_vm2 = vcmp.ne.s32.totalorder %v345_v10, %v1794_v32 }
 0x1b7   :  { %v2288_v28 = vsel %vm493_vm15, 1.0, %v2733_v35  ;;  %v2304_v9 = vsel %vm495_vm9, 1.0, %v2733_v35  ;;  %vm497_vm15 = vmand %vm465_vm10, %vm2297_vm11  ;;  %vm375_vm9 = vcmp.ne.s32.totalorder %v336_v42, %v1794_v32  ;;  %v2740_v42 = vmov 0 }
 0x1b8   :  { %vm2313_vm6 = vmand %vm382_vm14, %vm369_vm0  ;;  %v2319_v57 = vsel %vm497_vm15, 1.0, %v2733_v35  ;;  %vm460_vm15 = vcmp.eq.s32.totalorder %v1958_v50, %v1806_v36  ;;  %v2742_v50 = vmov 0 }
 0x1b9   :  { %v2737_v26 = vsel %vm2313_vm6, 4294967295, %v2736_v26  ;;  %vm2329_vm7 = vmand %vm384_vm2, %vm369_vm0 }
 0x1ba   :  { %vm2337_vm13 = vmand %vm375_vm9, %vm369_vm0  ;;  %vm462_vm9 = vcmp.eq.s32.totalorder %v1976_v0, %v1806_v36  ;;  %v921_v0 = vmul.f32 %v1852_v48, %v1985_v5  ;;  %v923_v48 = vmul.f32 %v1859_v49, %v1983_v4 }
 0x1bb   :  { %v441_v34 = vpop.permute.xlu0 %440  ;;  %v2741_v42 = vsel %vm2337_vm13, 4294967295, %v2740_v42 }
 0x1bc   :  { %vm467_vm1 = vcmp.eq.s32.totalorder %v441_v34, %v1806_v36 }
 0x1bd   :  { %vm499_vm10 = vmand %vm467_vm1, %vm2313_vm6  ;;  %vm377_vm1 = vcmp.ne.s32.totalorder %v338_v24, %v1794_v32 }
 0x1be   :  { %v2342_v10 = vsel %vm499_vm10, 1.0, %v2733_v35  ;;  %vm492_vm6 = vmand %vm460_vm15, %vm2337_vm13  ;;  %vm464_vm15 = vcmp.eq.s32.totalorder %v2007_v11, %v1806_v36  ;;  %vm383_vm13 = vcmp.ne.s32.totalorder %v344_v21, %v1794_v32  ;;  %v450_v21 = vpop.permute.xlu1 %449 }
 0x1bf   :  { %v447_v62 = vpop.permute.xlu0 %446  ;;  %vm2355_vm12 = vmand %vm377_vm1, %vm369_vm0  ;;  %v508_v8 = vsel %vm492_vm6, 1.0, %v2733_v35 }
 0x1c0   :  { %vm469_vm14 = vcmp.eq.s32.totalorder %v447_v62, %v1806_v36  ;;  %v340_v62 = vadd.s32 72, %v1792_v31  ;;  %v2743_v50 = vsel %vm2355_vm12, 4294967295, %v2742_v50  ;;  %v925_v49 = vmul.f32 %v508_v8, %v2081_v13 }
 0x1c1   :  { %vm501_vm2 = vmand %vm469_vm14, %vm2329_vm7 }
 0x1c2   :  { %v2360_v24 = vsel %vm501_vm2, 1.0, %v2733_v35  ;;  %vm379_vm10 = vcmp.ne.s32.totalorder %v340_v62, %v1794_v32  ;;  %vm494_vm14 = vmand %vm462_vm9, %vm2355_vm12  ;;  %vm381_vm2 = vcmp.ne.s32.totalorder %v342_v7, %v1794_v32  ;;  %vm466_vm9 = vcmp.eq.s32.totalorder %v2032_v22, %v1806_v36 }
 0x1c3   :  { %vm2374_vm1 = vmand %vm379_vm10, %vm369_vm0  ;;  %v510_v61 = vsel %vm494_vm14, 1.0, %v2733_v35  ;;  %v346_v7 = vadd.s32 120, %v1792_v31 }
 0x1c4   :  { %vm496_vm6 = vmand %vm464_vm15, %vm2374_vm1  ;;  %vm468_vm15 = vcmp.eq.s32.totalorder %v2059_v38, %v1806_v36  ;;  %v927_v38 = vmul.f32 %v510_v61, %v2065_v51 }
 0x1c5   :  { %vm2389_vm10 = vmand %vm381_vm2, %vm369_vm0  ;;  %vm385_vm12 = vcmp.ne.s32.totalorder %v346_v7, %v1794_v32  ;;  %v920_v32 = vmul.f32 %v1833_v43, %v1966_v58 }
 0x1c6   :  { %vm498_vm14 = vmand %vm466_vm9, %vm2389_vm10  ;;  %vm470_vm9 = vcmp.eq.s32.totalorder %v450_v21, %v1806_v36 }
 0x1c7   :  { %vm2403_vm2 = vmand %vm383_vm13, %vm369_vm0  ;;  %v2409_v31 = vsel %vm498_vm14, 1.0, %v2733_v35 }
 0x1c8   :  { %vm2418_vm13 = vmand %vm385_vm12, %vm369_vm0  ;;  %vm2752_vm0 = vnez %v2705_v46  ;;  %vm2756_vm12 = vnez %v2743_v50 }
 0x1c9   :  { %1028 = vadd.xlane.f32.xlu0 %v2288_v28  ;;  %vm502_vm14 = vmand %vm470_vm9, %vm2418_vm13 }
 0x1ca   :  { %v2430_v36 = vsel %vm502_vm14, 1.0, %v2733_v35 }
 0x1cd   :  { %1032 = vadd.xlane.f32.xlu0 %v2304_v9 }
 0x1d1   :  { %1036 = vadd.xlane.f32.xlu0 %v2319_v57 }
 0x1d5   :  { %1040 = vadd.xlane.f32.xlu0 %v2342_v10 }
 0x1d9   :  { %1044 = vadd.xlane.f32.xlu0 %v2360_v24 }
 0x1da   :  { %1026 = vadd.xlane.f32.xlu1 %v508_v8 }
 0x1dd   :  { %938 = vadd.xlane.f32.xlu0 %v921_v0  ;;  %v512_v0 = vsel %vm496_vm6, 1.0, %v2733_v35  ;;  %vm500_vm6 = vmand %vm468_vm15, %vm2403_vm2 }
 0x1de   :  { %1030 = vadd.xlane.f32.xlu1 %v510_v61  ;;  %v929_v7 = vmul.f32 %v512_v0, %v2034_v23  ;;  %v922_v61 = vmul.f32 %v1847_v47, %v1962_v54 }
 0x1e1   :  { %942 = vadd.xlane.f32.xlu0 %v923_v48  ;;  %v2423_v48 = vsel %vm500_vm6, 1.0, %v2733_v35  ;;  %v928_v35 = vmul.f32 %v2304_v9, %v1968_v59 }
 0x1e2   :  { %1034 = vadd.xlane.f32.xlu1 %v512_v0  ;;  %v926_v0 = vmul.f32 %v2288_v28, %v2009_v12 }
 0x1e5   :  { %946 = vadd.xlane.f32.xlu0 %v925_v49  ;;  %v924_v49 = vmul.f32 %v2062_v39, %v2047_v27 }
 0x1e6   :  { %1038 = vadd.xlane.f32.xlu1 %v2409_v31 }
 0x1e9   :  { %950 = vadd.xlane.f32.xlu0 %v927_v38 }
 0x1ea   :  { %1042 = vadd.xlane.f32.xlu1 %v2423_v48 }
 0x1ed   :  { %954 = vadd.xlane.f32.xlu0 %v929_v7 }
 0x1ee   :  { %1046 = vadd.xlane.f32.xlu1 %v2430_v36 }
 0x1f2   :  { %936 = vadd.xlane.f32.xlu1 %v920_v32 }
 0x1f6   :  { %940 = vadd.xlane.f32.xlu1 %v922_v61 }
 0x1fa   :  { %944 = vadd.xlane.f32.xlu1 %v924_v49 }
 0x1fe   :  { %948 = vadd.xlane.f32.xlu1 %v926_v0 }
 0x202   :  { %952 = vadd.xlane.f32.xlu1 %v928_v35 }
 0x20d   :  { %v700_v21 = vpop.permute.xlu0 %699  ;;  %v660_v38 = vpop.permute.xlu1 %659 }
 0x20e   :  { %v737_v43 = vsub.f32 %v1964_v55, %v700_v21  ;;  %v729_v7 = vsub.f32 %v1962_v54, %v660_v38 }
 0x210   :  { %v763_v47 = vmul.f32 1.442695, %v737_v43  ;;  %v747_v32 = vmul.f32 1.442695, %v729_v7 }
 0x211   :  { %v690_v61 = vpop.permute.xlu0 %689  ;;  %v650_v20 = vpop.permute.xlu1 %649 }
 0x212   :  { %1524 = vpow2.f32 %v763_v47  ;;  %v735_v39 = vsub.f32 %v1968_v59, %v690_v61  ;;  %v727_v28 = vsub.f32 %v1966_v58, %v650_v20 }
 0x213   :  { %1526 = vpow2.f32 %v747_v32 }
 0x214   :  { %v759_v49 = vmul.f32 1.442695, %v735_v39  ;;  %v743_v0 = vmul.f32 1.442695, %v727_v28 }
 0x215   :  { %v655_v9 = vpop.permute.xlu0 %654  ;;  %v665_v35 = vpop.permute.xlu1 %664 }
 0x216   :  { %1528 = vpow2.f32 %v759_v49  ;;  %v728_v15 = vsub.f32 %v1985_v5, %v655_v9  ;;  %v730_v21 = vsub.f32 %v1983_v4, %v665_v35 }
 0x217   :  { %1530 = vpow2.f32 %v743_v0 }
 0x218   :  { %v745_v54 = vmul.f32 1.442695, %v728_v15  ;;  %v749_v38 = vmul.f32 1.442695, %v730_v21 }
 0x219   :  { %v680_v43 = vpop.permute.xlu0 %679  ;;  %v705_v7 = vpop.permute.xlu1 %704 }
 0x21a   :  { %1532 = vpow2.f32 %v745_v54  ;;  %v733_v59 = vsub.f32 %v2009_v12, %v680_v43  ;;  %v738_v58 = vsub.f32 %v2019_v17, %v705_v7 }
 0x21b   :  { %1534 = vpow2.f32 %v749_v38 }
 0x21c   :  { %v755_v20 = vmul.f32 1.442695, %v733_v59  ;;  %v765_v47 = vmul.f32 1.442695, %v738_v58 }
 0x21d   :  { %v720_v32 = vpop.permute.xlu0 %719  ;;  %v695_v61 = vpop.permute.xlu1 %694 }
 0x21e   :  { %1536 = vpow2.f32 %v755_v20  ;;  %v741_v5 = vsub.f32 %v2021_v18, %v720_v32  ;;  %v736_v4 = vsub.f32 %v2034_v23, %v695_v61 }
 0x21f   :  { %v1525_v39 = vpop.eup %1524  ;;  %1538 = vpow2.f32 %v765_v47 }
 0x220   :  { %v1527_v15 = vpop.eup %1526  ;;  %v771_v28 = vmul.f32 1.442695, %v741_v5  ;;  %v761_v49 = vmul.f32 1.442695, %v736_v4  ;;  %v785_v12 = vsel %vm2297_vm11, %v1525_v39, 0.0 }
 0x221   :  { %v777_v0 = vsel %vm1817_vm5, %v1527_v15, 0.0  ;;  %v670_v9 = vpop.permute.xlu0 %669  ;;  %843 = vadd.xlane.f32.xlu1 %v785_v12  ;;  %vm2754_vm5 = vnez %v2707_v25 }
 0x222   :  { %1540 = vpow2.f32 %v771_v28  ;;  %827 = vadd.xlane.f32.xlu0 %v777_v0  ;;  %v731_v35 = vsub.f32 %v2047_v27, %v670_v9 }
 0x223   :  { %v1529_v21 = vpop.eup %1528  ;;  %1542 = vpow2.f32 %v761_v49 }
 0x224   :  { %v1531_v23 = vpop.eup %1530  ;;  %v751_v54 = vmul.f32 1.442695, %v731_v35  ;;  %v783_v38 = vsel %vm2281_vm3, %v1529_v21, 0.0  ;;  %vm2758_vm3 = vcmask 7168  }
 0x225   :  { %v710_v43 = vpop.permute.xlu0 %709  ;;  %839 = vadd.xlane.f32.xlu1 %v783_v38  ;;  %v775_v16 = vsel %vm1811_vm4, %v1531_v23, 0.0  ;;  %v685_v40 = vpop.permute.xlu1 %684  ;;  %vm2753_vm4 = vnez %v2730_v56  ;;  %vm2759_vm11 = vmmov %vm2758_vm3 }
 0x226   :  { %1544 = vpow2.f32 %v751_v54  ;;  %v739_v7 = vsub.f32 %v2054_v30, %v710_v43  ;;  %823 = vadd.xlane.f32.xlu0 %v775_v16  ;;  %v734_v59 = vsub.f32 %v2065_v51, %v685_v40  ;;  %v930_v43 = vmul.f32 %v2319_v57, %v1964_v55 }
 0x227   :  { %v1533_v27 = vpop.eup %1532  ;;  %v932_v40 = vmul.f32 %v2342_v10, %v2054_v30  ;;  %v931_v57 = vmul.f32 %v2409_v31, %v2019_v17  ;;  %v933_v30 = vmul.f32 %v2423_v48, %v2087_v19  ;;  %v1006_v10 = vld [vmem:[#allocation5 + $0x30] sm:$0xff] }
 0x228   :  { %v1535_v58 = vpop.eup %1534  ;;  %v767_v20 = vmul.f32 1.442695, %v739_v7  ;;  %v757_v47 = vmul.f32 1.442695, %v734_v59  ;;  %v776_v3 = vsel %vm1825_vm8, %v1533_v27, 0.0  ;;  %vm2755_vm8 = vnez %v2737_v26  ;;  %v1010_v27 = vld [vmem:[#allocation5 + $0x50] sm:$0xff] }
 0x229   :  { %825 = vadd.xlane.f32.xlu1 %v776_v3  ;;  %v778_v32 = vsel %vm2752_vm0, %v1535_v58, 0.0  ;;  %v725_v37 = vpop.permute.xlu1 %724  ;;  %v934_v7 = vmul.f32 %v2360_v24, %v2021_v18  ;;  %v1008_v24 = vld [vmem:[#allocation5 + $0x40] sm:$0xff] }
 0x22a   :  { %1546 = vpow2.f32 %v767_v20  ;;  %829 = vadd.xlane.f32.xlu0 %v778_v32  ;;  %v742_v61 = vsub.f32 %v2071_v60, %v725_v37  ;;  %v1012_v58 = vld [vmem:[#allocation5 + $0x60] sm:$0xff]  ;;  %v905_v37 = vld [vmem:[#allocation4 + $0x8] sm:$0xff] }
 0x22b   :  { %v1537_v5 = vpop.eup %1536  ;;  %1548 = vpow2.f32 %v757_v47 }
 0x22c   :  { %v1539_v4 = vpop.eup %1538  ;;  %v773_v51 = vmul.f32 1.442695, %v742_v61  ;;  %v781_v39 = vsel %vm2753_vm4, %v1537_v5, 0.0  ;;  %v1007_v61 = vld [vmem:[#allocation5 + $0x38] sm:$0xff] }
 0x22d   :  { %835 = vadd.xlane.f32.xlu1 %v781_v39  ;;  %v786_v41 = vsel %vm2389_vm10, %v1539_v4, 0.0  ;;  %v675_v15 = vpop.permute.xlu1 %674 }
 0x22e   :  { %1550 = vpow2.f32 %v773_v51  ;;  %845 = vadd.xlane.f32.xlu0 %v786_v41  ;;  %v732_v46 = vsub.f32 %v2081_v13, %v675_v15  ;;  %v907_v41 = vld [vmem:[#allocation4 + $0x18] sm:$0xff]  ;;  %v1009_v15 = vld [vmem:[#allocation5 + $0x48] sm:$0xff] }
 0x22f   :  { %v1541_v28 = vpop.eup %1540 }
 0x230   :  { %v1543_v49 = vpop.eup %1542  ;;  %v753_v12 = vmul.f32 1.442695, %v732_v46  ;;  %v789_v0 = vsel %vm2329_vm7, %v1541_v28, 0.0  ;;  %vm2757_vm7 = vnez %v2741_v42  ;;  %v935_v42 = vmul.f32 %v2430_v36, %v2071_v60  ;;  %v1014_v60 = vld [vmem:[#allocation5 + $0x70] sm:$0xff]  ;;  %v1005_v36 = vld [vmem:[#allocation5 + $0x28] sm:$0xff] }
 0x231   :  { %851 = vadd.xlane.f32.xlu1 %v789_v0  ;;  %v784_v56 = vsel %vm2374_vm1, %v1543_v49, 0.0  ;;  %v715_v9 = vpop.permute.xlu1 %714  ;;  %vm2760_vm1 = vmmov %vm2758_vm3  ;;  %v909_v0 = vld [vmem:[#allocation4 + $0x28] sm:$0xff] }
 0x232   :  { %1552 = vpow2.f32 %v753_v12  ;;  %841 = vadd.xlane.f32.xlu0 %v784_v56  ;;  %v740_v11 = vsub.f32 %v2087_v19, %v715_v9  ;;  %vm2761_vm10 = vmmov %vm2760_vm1  ;;  %v1011_v56 = vld [vmem:[#allocation5 + $0x58] sm:$0xff] }
 0x233   :  { %v1545_v35 = vpop.eup %1544  ;;  %vm2762_vm15 = vmmov %vm2760_vm1 }
 0x234   :  { %v769_v21 = vmul.f32 1.442695, %v740_v11  ;;  %v779_v13 = vsel %vm2754_vm5, %v1545_v35, 0.0  ;;  %vm2764_vm6 = vmmov %vm2760_vm1 }
 0x235   :  { %831 = vadd.xlane.f32.xlu1 %v779_v13  ;;  %vm2765_vm9 = vmmov %vm2760_vm1  ;;  %v911_v13 = vld [vmem:[#allocation4 + $0x38] sm:$0xff] }
 0x236   :  { %1554 = vpow2.f32 %v769_v21  ;;  %vm2767_vm14 = vmmov %vm2760_vm1 }
 0x237   :  { %v1547_v23 = vpop.eup %1546  ;;  %vm2768_vm0 = vmmov %vm2760_vm1 }
 0x238   :  { %v1549_v54 = vpop.eup %1548  ;;  %v787_v34 = vsel %vm2755_vm8, %v1547_v23, 0.0  ;;  %v1013_v23 = vld [vmem:[#allocation5 + $0x68] sm:$0xff]  ;;  %vm2769_vm4 = vmmov %vm2768_vm0 }
 0x239   :  { %847 = vadd.xlane.f32.xlu1 %v787_v34  ;;  %v782_v62 = vsel %vm2756_vm12, %v1549_v54, 0.0  ;;  %vm2770_vm5 = vmmov %vm2768_vm0 }
 0x23a   :  { %837 = vadd.xlane.f32.xlu0 %v782_v62  ;;  %vm2771_vm8 = vmmov %vm2768_vm0 }
 0x23b   :  { %v1551_v38 = vpop.eup %1550  ;;  %vm2772_vm12 = vmmov %vm2768_vm0 }
 0x23c   :  { %v790_v25 = vsel %vm2418_vm13, %v1551_v38, 0.0  ;;  %vm2766_vm13 = vmmov %vm2760_vm1 }
 0x23d   :  { %956 = vadd.xlane.f32.xlu1 %v930_v43  ;;  %v913_v43 = vld [vmem:[#allocation4 + $0x48] sm:$0xff] }
 0x23e   :  { %853 = vadd.xlane.f32.xlu0 %v790_v25  ;;  %v1015_v25 = vld [vmem:[#allocation5 + $0x78] sm:$0xff] }
 0x23f   :  { %v1553_v16 = vpop.eup %1552 }
 0x240   :  { %v780_v26 = vsel %vm2757_vm7, %v1553_v16, 0.0  ;;  %vm2773_vm7 = vmmov %vm2768_vm0 }
 0x241   :  { %960 = vadd.xlane.f32.xlu1 %v932_v40 }
 0x242   :  { %833 = vadd.xlane.f32.xlu0 %v780_v26 }
 0x243   :  { %v1555_v50 = vpop.eup %1554 }
 0x244   :  { %v788_v55 = vsel %vm2403_vm2, %v1555_v50, 0.0  ;;  %vm2763_vm2 = vmmov %vm2760_vm1 }
 0x245   :  { %964 = vadd.xlane.f32.xlu1 %v934_v7  ;;  %v904_v7 = vld [vmem:[#allocation4] sm:$0xff] }
 0x246   :  { %849 = vadd.xlane.f32.xlu0 %v788_v55 }
 0x24a   :  { %958 = vadd.xlane.f32.xlu0 %v931_v57 }
 0x24e   :  { %962 = vadd.xlane.f32.xlu0 %v933_v30  ;;  %v906_v30 = vld [vmem:[#allocation4 + $0x10] sm:$0xff] }
 0x252   :  { %966 = vadd.xlane.f32.xlu0 %v935_v42  ;;  %v1029_v8 = vpop.xlane.xlu0 %1028 }
 0x253   :  { %v1054_v18 = vadd.f32 %v1029_v8, %v1006_v10  ;;  %v908_v8 = vld [vmem:[#allocation4 + $0x20] sm:$0xff] }
 0x255   :  { %1070 = vst.msk [vmem:[#allocation5 + $0x30] sm:$0xff] %vm2758_vm3, %v1054_v18  ;;  %vm2774_vm3 = vmmov %vm2768_vm0 }
 0x256   :  { %v1033_v22 = vpop.xlane.xlu0 %1032 }
 0x257   :  { %v1056_v59 = vadd.f32 %v1033_v22, %v1008_v24  ;;  %v910_v22 = vld [vmem:[#allocation4 + $0x30] sm:$0xff] }
 0x259   :  { %1072 = vst.msk [vmem:[#allocation5 + $0x40] sm:$0xff] %vm2759_vm11, %v1056_v59  ;;  %vm2775_vm11 = vmmov %vm2768_vm0 }
 0x25a   :  { %v1037_v17 = vpop.xlane.xlu0 %1036 }
 0x25b   :  { %v1058_v31 = vadd.f32 %v1037_v17, %v1010_v27  ;;  %v912_v17 = vld [vmem:[#allocation4 + $0x40] sm:$0xff] }
 0x25d   :  { %1074 = vst.msk [vmem:[#allocation5 + $0x50] sm:$0xff] %vm2760_vm1, %v1058_v31  ;;  %vm2776_vm1 = vmmov %vm2768_vm0 }
 0x25e   :  { %v1041_v19 = vpop.xlane.xlu0 %1040 }
 0x25f   :  { %v1060_v48 = vadd.f32 %v1041_v19, %v1012_v58  ;;  %v2779_v19 = vsub.f32 %v2101_v29, %v2106_v44  ;;  %v2784_v44 = vld [vmem:[#allocation9_spill] sm:$0xff] }
 0x261   :  { %1076 = vst.msk [vmem:[#allocation5 + $0x60] sm:$0xff] %vm2761_vm10, %v1060_v48  ;;  %vm2777_vm10 = vmmov %vm2768_vm0  ;;  %v635_v48 = vmul.f32 1.442695, %v2779_v19 }
 0x262   :  { %v1045_v20 = vpop.xlane.xlu0 %1044 }
 0x263   :  { %v1062_v47 = vadd.f32 %v1045_v20, %v1014_v60  ;;  %v1027_v3 = vpop.xlane.xlu1 %1026  ;;  %v2780_v60 = vsub.f32 %v2103_v33, %v2109_v45  ;;  %1556 = vpow2.f32 %v635_v48  ;;  %v2781_v20 = vsub.f32 %v2111_v52, %v2126_v63 }
 0x264   :  { %v1053_v32 = vadd.f32 %v1027_v3, %v1005_v36  ;;  %v2782_v3 = vsub.f32 %v2113_v53, %v2129_v1  ;;  %v2785_v33 = vsub.f32 %v2133_v6, %v2784_v44  ;;  %v2796_v6 = vld [vmem:[#allocation17_spill] sm:$0xff]  ;;  %v2575_v44 = vld [vmem:[#allocation5 + $0x18] sm:$0xff] }
 0x265   :  { %1078 = vst.msk [vmem:[#allocation5 + $0x70] sm:$0xff] %vm2762_vm15, %v1062_v47  ;;  %vm2778_vm15 = vmmov %vm2768_vm0  ;;  %v619_v36 = vmul.f32 1.442695, %v2780_v60  ;;  %v631_v47 = vmul.f32 1.442695, %v2781_v20  ;;  %v794_v60 = vld [vmem:[#allocation3 + $0x18] sm:$0xff] }
 0x266   :  { %1069 = vst.msk [vmem:[#allocation5 + $0x28] sm:$0xff] %vm2763_vm2, %v1053_v32  ;;  %v939_v5 = vpop.xlane.xlu0 %938  ;;  %v615_v32 = vmul.f32 1.442695, %v2782_v3  ;;  %v621_v45 = vmul.f32 1.442695, %v2785_v33  ;;  %vm2804_vm2 = vmmov %vm2768_vm0  ;;  %v2810_v3 = vld [vmem:[#allocation25_spill] sm:$0xff] }
 0x267   :  { %v969_v4 = vadd.f32 %v939_v5, %v905_v37  ;;  %v1031_v51 = vpop.xlane.xlu1 %1030  ;;  %1558 = vpow2.f32 %v619_v36  ;;  %v2783_v37 = vsub.f32 %v2131_v2, %v2146_v14  ;;  %v2787_v5 = vld [vmem:[#allocation12_spill] sm:$0xff] }
 0x268   :  { %v1055_v39 = vadd.f32 %v1031_v51, %v1007_v61  ;;  %1560 = vpow2.f32 %v631_v47  ;;  %v2786_v61 = vld [vmem:[#allocation10_spill] sm:$0xff]  ;;  %v2790_v51 = vld [vmem:[#allocation13_spill] sm:$0xff]  ;;  %v2809_v47 = vld [vmem:[#allocation24_spill] sm:$0xff] }
 0x269   :  { %985 = vst.msk [vmem:[#allocation4 + $0x8] sm:$0xff] %vm2764_vm6, %v969_v4  ;;  %v617_v29 = vmul.f32 1.442695, %v2783_v37  ;;  %1562 = vpow2.f32 %v615_v32  ;;  %v2788_v52 = vsub.f32 %v2786_v61, %v2787_v5  ;;  %v2789_v4 = vld [vmem:[#allocation11_spill] sm:$0xff]  ;;  %vm2808_vm6 = vmmov %vm2768_vm0  ;;  %v2811_v32 = vsub.f32 %v2809_v47, %v2810_v3 }
 0x26a   :  { %1071 = vst.msk [vmem:[#allocation5 + $0x38] sm:$0xff] %vm2765_vm9, %v1055_v39  ;;  %v943_v46 = vpop.xlane.xlu0 %942  ;;  %v2791_v53 = vsub.f32 %v2789_v4, %v2790_v51  ;;  %v2792_v39 = vld [vmem:[#allocation14_spill] sm:$0xff]  ;;  %vm2812_vm9 = vmmov %vm2768_vm0  ;;  %v797_v5 = vld [vmem:[#allocation3 + $0x30] sm:$0xff] }
 0x26b   :  { %v971_v28 = vadd.f32 %v943_v46, %v907_v41  ;;  %v1035_v49 = vpop.xlane.xlu1 %1034  ;;  %1564 = vpow2.f32 %v617_v29  ;;  %v627_v63 = vmul.f32 1.442695, %v2788_v52  ;;  %v2793_v41 = vld [vmem:[#allocation16_spill] sm:$0xff]  ;;  %v2795_v46 = vld [vmem:[#allocation15_spill] sm:$0xff]  ;;  %v645_v37 = vmul.f32 1.442695, %v2811_v32 }
 0x26c   :  { %v1057_v12 = vadd.f32 %v1035_v49, %v1009_v15  ;;  %1566 = vpow2.f32 %v621_v45  ;;  %v637_v1 = vmul.f32 1.442695, %v2791_v53  ;;  %v2794_v2 = vsub.f32 %v2792_v39, %v2793_v41  ;;  %v802_v51 = vld [vmem:[#allocation3 + $0x58] sm:$0xff]  ;;  %v2814_v39 = vld [vmem:[#allocation26_spill] sm:$0xff]  ;;  %v2815_v41 = vld [vmem:[#allocation27_spill] sm:$0xff] }
 0x26d   :  { %987 = vst.msk [vmem:[#allocation4 + $0x18] sm:$0xff] %vm2766_vm13, %v971_v28  ;;  %1568 = vpow2.f32 %v627_v63  ;;  %v2797_v28 = vsub.f32 %v2795_v46, %v2796_v6  ;;  %vm2813_vm13 = vmmov %vm2768_vm0 }
 0x26e   :  { %1073 = vst.msk [vmem:[#allocation5 + $0x48] sm:$0xff] %vm2767_vm14, %v1057_v12  ;;  %v947_v9 = vpop.xlane.xlu0 %946  ;;  %v643_v14 = vmul.f32 1.442695, %v2794_v2  ;;  %1570 = vpow2.f32 %v637_v1  ;;  %v801_v12 = vld [vmem:[#allocation3 + $0x50] sm:$0xff]  ;;  %v1102_v1 = vmax.f32 %v2575_v44, 1.0  ;;  %v2816_v2 = vsub.f32 %v2814_v39, %v2815_v41  ;;  %vm2817_vm14 = vmmov %vm2768_vm0 }
 0x26f   :  { %v973_v11 = vadd.f32 %v947_v9, %v909_v0  ;;  %v1039_v35 = vpop.xlane.xlu1 %1038  ;;  %v633_v49 = vmul.f32 1.442695, %v2797_v28  ;;  %v2798_v9 = vld [vmem:[#allocation18_spill] sm:$0xff]  ;;  %v1165_v39 = vld [vmem:[#allocation2 + $0x10] sm:$0xff] }
 0x270   :  { %v1059_v21 = vadd.f32 %v1039_v35, %v1011_v56  ;;  %v1557_v15 = vpop.eup %1556  ;;  %v793_v56 = vld [vmem:[#allocation3 + $0x10] sm:$0xff]  ;;  %1572 = vpow2.f32 %v643_v14  ;;  %v625_v14 = vmul.f32 1.442695, %v2816_v2  ;;  %v2606_v2 = vld [vmem:[#allocation5 + $0x60] sm:$0xff] }
 0x271   :  { %989 = vst.msk [vmem:[#allocation4 + $0x28] sm:$0xff] %vm2768_vm0, %v973_v11  ;;  %v2799_v11 = vld [vmem:[#allocation19_spill] sm:$0xff]  ;;  %1574 = vpow2.f32 %v633_v49 }
 0x272   :  { %1075 = vst.msk [vmem:[#allocation5 + $0x58] sm:$0xff] %vm2769_vm4, %v1059_v21  ;;  %v951_v54 = vpop.xlane.xlu0 %950  ;;  %v2800_v35 = vsub.f32 %v2798_v9, %v2799_v11  ;;  %v800_v11 = vld [vmem:[#allocation3 + $0x48] sm:$0xff]  ;;  %vm2821_vm4 = vmmov %vm2768_vm0 }
 0x273   :  { %v975_v34 = vadd.f32 %v951_v54, %v911_v13  ;;  %v1043_v62 = vpop.xlane.xlu1 %1042  ;;  %v817_v13 = vmul.f32 %v1557_v15, %v801_v12  ;;  %v805_v12 = vld [vmem:[#allocation3 + $0x70] sm:$0xff] }
 0x274   :  { %v1061_v38 = vadd.f32 %v1043_v62, %v1013_v23  ;;  %v1559_v0 = vpop.eup %1558  ;;  %v623_v21 = vmul.f32 1.442695, %v2800_v35  ;;  %v2557_v23 = vld [vmem:[#allocation5 + $0x10] sm:$0xff] }
 0x275   :  { %991 = vst.msk [vmem:[#allocation4 + $0x38] sm:$0xff] %vm2770_vm5, %v975_v34  ;;  %v1561_v54 = vpop.eup %1560  ;;  %v809_v34 = vmul.f32 %v1559_v0, %v793_v56  ;;  %vm2822_vm5 = vmmov %vm2768_vm0 }
 0x276   :  { %1077 = vst.msk [vmem:[#allocation5 + $0x68] sm:$0xff] %vm2771_vm8, %v1061_v38  ;;  %v955_v16 = vpop.xlane.xlu0 %954  ;;  %v799_v38 = vld [vmem:[#allocation3 + $0x40] sm:$0xff]  ;;  %1576 = vpow2.f32 %v623_v21  ;;  %vm2823_vm8 = vmmov %vm2768_vm0 }
 0x277   :  { %v977_v40 = vadd.f32 %v955_v16, %v913_v43  ;;  %v1047_v26 = vpop.xlane.xlu1 %1046  ;;  %v1563_v43 = vpop.eup %1562  ;;  %v2584_v21 = vld [vmem:[#allocation5 + $0x40] sm:$0xff] }
 0x278   :  { %v1063_v50 = vadd.f32 %v1047_v26, %v1015_v25 }
 0x279   :  { %993 = vst.msk [vmem:[#allocation4 + $0x48] sm:$0xff] %vm2772_vm12, %v977_v40  ;;  %v791_v40 = vld [vmem:[#allocation3] sm:$0xff]  ;;  %vm2824_vm12 = vmmov %vm2768_vm0 }
 0x27a   :  { %1079 = vst.msk [vmem:[#allocation5 + $0x78] sm:$0xff] %vm2773_vm7, %v1063_v50  ;;  %v1101_v50 = vmax.f32 %v2557_v23, 1.0  ;;  %vm2825_vm7 = vmmov %vm2768_vm0 }
 0x27b   :  { %v937_v55 = vpop.xlane.xlu1 %936 }
 0x27c   :  { %v968_v57 = vadd.f32 %v937_v55, %v904_v7  ;;  %v2801_v7 = vld [vmem:[#allocation20_spill] sm:$0xff]  ;;  %v2802_v55 = vld [vmem:[#allocation22_spill] sm:$0xff]  ;;  %1578 = vrcp.f32 %v1101_v50 }
 0x27d   :  { %v2591_v50 = vld [vmem:[#allocation5 + $0x8] sm:$0xff] }
 0x27e   :  { %984 = vst.msk [vmem:[#allocation4] sm:$0xff] %vm2774_vm3, %v968_v57  ;;  %v2803_v57 = vsub.f32 %v2801_v7, %v2802_v55  ;;  %vm2826_vm3 = vmmov %vm2768_vm0 }
 0x27f   :  { %v941_v42 = vpop.xlane.xlu1 %940 }
 0x280   :  { %v970_v10 = vadd.f32 %v941_v42, %v906_v30  ;;  %v639_v30 = vmul.f32 1.442695, %v2803_v57  ;;  %v815_v42 = vmul.f32 %v1561_v54, %v799_v38  ;;  %v2819_v54 = vld [vmem:[#allocation29_spill] sm:$0xff]  ;;  %v2593_v57 = vld [vmem:[#allocation5 + $0x50] sm:$0xff] }
 0x282   :  { %986 = vst.msk [vmem:[#allocation4 + $0x10] sm:$0xff] %vm2775_vm11, %v970_v10  ;;  %v2564_v10 = vld [vmem:[#allocation5] sm:$0xff]  ;;  %1580 = vpow2.f32 %v639_v30  ;;  %v1107_v30 = vmax.f32 %v2584_v21, 1.0  ;;  %vm2827_vm11 = vmmov %vm2768_vm0 }
 0x283   :  { %v945_v18 = vpop.xlane.xlu1 %944  ;;  %v1099_v20 = vmax.f32 %v2564_v10, 1.0 }
 0x284   :  { %v972_v24 = vadd.f32 %v945_v18, %v908_v8  ;;  %v1565_v8 = vpop.eup %1564  ;;  %v2805_v18 = vld [vmem:[#allocation21_spill] sm:$0xff] }
 0x285   :  { %v1131_v3 = vld [vmem:[#allocation4] sm:$0xff] }
 0x286   :  { %988 = vst.msk [vmem:[#allocation4 + $0x20] sm:$0xff] %vm2776_vm1, %v972_v24  ;;  %v2806_v24 = vld [vmem:[#allocation23_spill] sm:$0xff]  ;;  %vm2828_vm1 = vmmov %vm2768_vm0 }
 0x287   :  { %v949_v59 = vpop.xlane.xlu1 %948 }
 0x288   :  { %v974_v27 = vadd.f32 %v949_v59, %v910_v22  ;;  %v2807_v22 = vsub.f32 %v2805_v18, %v2806_v24 }
 0x289   :  { %v1133_v24 = vld [vmem:[#allocation4 + $0x10] sm:$0xff] }
 0x28a   :  { %990 = vst.msk [vmem:[#allocation4 + $0x30] sm:$0xff] %vm2777_vm10, %v974_v27  ;;  %v629_v59 = vmul.f32 1.442695, %v2807_v22  ;;  %v807_v27 = vmul.f32 %v1563_v43, %v791_v40  ;;  %vm1277_vm10 = vcmp.gt.f32.partialorder %v2557_v23, 0.0 }
 0x28b   :  { %v953_v31 = vpop.xlane.xlu1 %952 }
 0x28c   :  { %v976_v58 = vadd.f32 %v953_v31, %v912_v17  ;;  %v792_v31 = vld [vmem:[#allocation3 + $0x8] sm:$0xff]  ;;  %1582 = vpow2.f32 %v629_v59 }
 0x28d   :  { %v808_v29 = vmul.f32 %v1565_v8, %v792_v31  ;;  %1584 = vrcp.f32 %v1099_v20  ;;  %v2600_v20 = vld [vmem:[#allocation5 + $0x30] sm:$0xff] }
 0x28e   :  { %992 = vst.msk [vmem:[#allocation4 + $0x40] sm:$0xff] %vm2778_vm15, %v976_v58  ;;  %v1567_v58 = vpop.eup %1566  ;;  %1586 = vpow2.f32 %v645_v37  ;;  %vm2829_vm15 = vmmov %vm2768_vm0 }
 0x28f   :  { %v1569_v33 = vpop.eup %1568  ;;  %v810_v45 = vmul.f32 %v1567_v58, %v794_v60  ;;  %v803_v58 = vld [vmem:[#allocation3 + $0x60] sm:$0xff] }
 0x290   :  { %v1571_v52 = vpop.eup %1570  ;;  %v813_v15 = vmul.f32 %v1569_v33, %v797_v5 }
 0x291   :  { %v1573_v6 = vpop.eup %1572  ;;  %v818_v28 = vmul.f32 %v1571_v52, %v802_v51  ;;  %v1105_v52 = vmax.f32 %v2600_v20, 1.0 }
 0x292   :  { %v1575_v0 = vpop.eup %1574  ;;  %v821_v38 = vmul.f32 %v1573_v6, %v805_v12 }
 0x2aa   :  { %v844_v62 = vpop.xlane.xlu1 %843 }
 0x2ab   :  { %v828_v25 = vpop.xlane.xlu0 %827  ;;  %v865_v16 = vadd.f32 %v844_v62, %v817_v13  ;;  %v2818_v13 = vld [vmem:[#allocation28_spill] sm:$0xff] }
 0x2ac   :  { %v857_v26 = vadd.f32 %v828_v25, %v809_v34  ;;  %v2820_v34 = vsub.f32 %v2818_v13, %v2819_v54  ;;  %v1577_v25 = vpop.eup %1576  ;;  %v796_v13 = vld [vmem:[#allocation3 + $0x28] sm:$0xff] }
 0x2ad   :  { %882 = vst.msk [vmem:[#allocation3 + $0x50] sm:$0xff] %vm2804_vm2, %v865_v16  ;;  %v816_v16 = vmul.f32 %v1575_v0, %v800_v11  ;;  %v1579_v8 = vpop.eup %1578  ;;  %vm2830_vm2 = vmmov %vm2768_vm0 }
 0x2ae   :  { %874 = vst.msk [vmem:[#allocation3 + $0x10] sm:$0xff] %vm2808_vm6, %v857_v26  ;;  %v840_v17 = vpop.xlane.xlu1 %839  ;;  %v641_v62 = vmul.f32 1.442695, %v2820_v34  ;;  %v795_v26 = vld [vmem:[#allocation3 + $0x20] sm:$0xff]  ;;  %v1149_v47 = vmul.f32 %v1579_v8, %v1133_v24  ;;  %vm1275_vm6 = vcmp.gt.f32.partialorder %v2564_v10, 0.0 }
 0x2af   :  { %v824_v19 = vpop.xlane.xlu0 %823  ;;  %v863_v48 = vadd.f32 %v840_v17, %v815_v42  ;;  %v811_v18 = vmul.f32 %v1577_v25, %v795_v26  ;;  %v1581_v17 = vpop.eup %1580  ;;  %v1163_v34 = vld [vmem:[#allocation2] sm:$0xff] }
 0x2b0   :  { %v855_v36 = vadd.f32 %v824_v19, %v807_v27  ;;  %v1100_v27 = vmax.f32 %v2591_v50, 1.0  ;;  %v1109_v19 = vmax.f32 %v2593_v57, 1.0 }
 0x2b1   :  { %880 = vst.msk [vmem:[#allocation3 + $0x40] sm:$0xff] %vm2812_vm9, %v863_v48  ;;  %v1583_v48 = vpop.eup %1582  ;;  %vm2831_vm9 = vmmov %vm2768_vm0 }
 0x2b2   :  { %872 = vst.msk [vmem:[#allocation3] sm:$0xff] %vm2813_vm13, %v855_v36  ;;  %v826_v61 = vpop.xlane.xlu1 %825  ;;  %v798_v36 = vld [vmem:[#allocation3 + $0x38] sm:$0xff]  ;;  %v1585_v37 = vpop.eup %1584  ;;  %vm2832_vm13 = vmmov %vm2768_vm0 }
 0x2b3   :  { %v830_v63 = vpop.xlane.xlu0 %829  ;;  %v856_v4 = vadd.f32 %v826_v61, %v808_v29  ;;  %v819_v29 = vmul.f32 %v1581_v17, %v803_v58  ;;  %v814_v61 = vmul.f32 %v1583_v48, %v798_v36  ;;  %v1147_v41 = vmul.f32 %v1585_v37, %v1131_v3  ;;  %v1139_v37 = vld [vmem:[#allocation4 + $0x40] sm:$0xff] }
 0x2b4   :  { %v858_v53 = vadd.f32 %v830_v63, %v810_v45  ;;  %v1205_v32 = vld [vmem:[#allocation3 + $0x50] sm:$0xff]  ;;  %v1587_v45 = vpop.eup %1586  ;;  %v2604_v63 = vld [vmem:[#allocation5 + $0x20] sm:$0xff] }
 0x2b5   :  { %873 = vst.msk [vmem:[#allocation3 + $0x8] sm:$0xff] %vm2817_vm14, %v856_v4  ;;  %v1197_v46 = vld [vmem:[#allocation3 + $0x10] sm:$0xff]  ;;  %vm1278_vm14 = vcmp.gt.f32.partialorder %v2575_v44, 0.0 }
 0x2b6   :  { %875 = vst.msk [vmem:[#allocation3 + $0x18] sm:$0xff] %vm2768_vm0, %v858_v53  ;;  %v836_v49 = vpop.xlane.xlu1 %835  ;;  %1588 = vlog2.f32 %v1197_v46  ;;  %v1181_v46 = vsub.f32 %v1149_v47, %v1165_v39 }
 0x2b7   :  { %v846_v56 = vpop.xlane.xlu0 %845  ;;  %v861_v9 = vadd.f32 %v836_v49, %v813_v15  ;;  %1590 = vrcp.f32 %v1102_v1  ;;  %v806_v1 = vld [vmem:[#allocation3 + $0x78] sm:$0xff]  ;;  %v914_v15 = vld [vmem:[#allocation4 + $0x50] sm:$0xff]  ;;  %v2608_v49 = vld [vmem:[#allocation5 + $0x48] sm:$0xff] }
 0x2b8   :  { %v866_v35 = vadd.f32 %v846_v56, %v818_v28  ;;  %1592 = vpow2.f32 %v625_v14  ;;  %v1203_v59 = vld [vmem:[#allocation3 + $0x40] sm:$0xff]  ;;  %v1134_v28 = vld [vmem:[#allocation4 + $0x18] sm:$0xff]  ;;  %v1103_v56 = vmax.f32 %v2604_v63, 1.0  ;;  %v822_v11 = vmul.f32 %v1587_v45, %v806_v1 }
 0x2b9   :  { %878 = vst.msk [vmem:[#allocation3 + $0x30] sm:$0xff] %vm2821_vm4, %v861_v9  ;;  %v1195_v43 = vld [vmem:[#allocation3] sm:$0xff]  ;;  %v1108_v26 = vmax.f32 %v2608_v49, 1.0  ;;  %vm2833_vm4 = vmmov %vm2768_vm0 }
 0x2ba   :  { %883 = vst.msk [vmem:[#allocation3 + $0x58] sm:$0xff] %vm2822_vm5, %v866_v35  ;;  %v852_v40 = vpop.xlane.xlu1 %851  ;;  %1594 = vlog2.f32 %v1195_v43  ;;  %vm1285_vm5 = vcmp.gt.f32.partialorder %v2593_v57, 0.0 }
 0x2bb   :  { %v842_v7 = vpop.xlane.xlu0 %841  ;;  %v869_v55 = vadd.f32 %v852_v40, %v821_v38  ;;  %1596 = vpow2.f32 %v641_v62  ;;  %v1111_v62 = vmax.f32 %v2606_v2, 1.0 }
 0x2bc   :  { %v864_v42 = vadd.f32 %v842_v7, %v816_v16  ;;  %v1196_v33 = vld [vmem:[#allocation3 + $0x8] sm:$0xff]  ;;  %v1179_v16 = vsub.f32 %v1147_v41, %v1163_v34  ;;  %v2615_v7 = vld [vmem:[#allocation5 + $0x38] sm:$0xff] }
 0x2bd   :  { %886 = vst.msk [vmem:[#allocation3 + $0x70] sm:$0xff] %vm2823_vm8, %v869_v55  ;;  %v1198_v22 = vld [vmem:[#allocation3 + $0x18] sm:$0xff]  ;;  %vm2834_vm8 = vmmov %vm2768_vm0 }
 0x2be   :  { %881 = vst.msk [vmem:[#allocation3 + $0x48] sm:$0xff] %vm2824_vm12, %v864_v42  ;;  %v832_v31 = vpop.xlane.xlu1 %831  ;;  %1598 = vlog2.f32 %v1198_v22  ;;  %v916_v42 = vld [vmem:[#allocation4 + $0x60] sm:$0xff]  ;;  %vm1283_vm12 = vcmp.gt.f32.partialorder %v2584_v21, 0.0 }
 0x2bf   :  { %v859_v60 = vadd.f32 %v832_v31, %v811_v18  ;;  %1600 = vrcp.f32 %v1107_v30  ;;  %v2617_v18 = vld [vmem:[#allocation5 + $0x58] sm:$0xff]  ;;  %v804_v31 = vld [vmem:[#allocation3 + $0x68] sm:$0xff] }
 0x2c0   :  { %1602 = vlog2.f32 %v1203_v59  ;;  %v1201_v0 = vld [vmem:[#allocation3 + $0x30] sm:$0xff] }
 0x2c1   :  { %876 = vst.msk [vmem:[#allocation3 + $0x20] sm:$0xff] %vm2825_vm7, %v859_v60  ;;  %1604 = vrcp.f32 %v1100_v27  ;;  %v1106_v60 = vmax.f32 %v2615_v7, 1.0  ;;  %vm2835_vm7 = vmmov %vm2768_vm0 }
 0x2c2   :  { %v848_v5 = vpop.xlane.xlu1 %847  ;;  %1606 = vrcp.f32 %v1109_v19  ;;  %v1166_v19 = vld [vmem:[#allocation2 + $0x18] sm:$0xff] }
 0x2c3   :  { %v1589_v4 = vpop.eup %1588  ;;  %v838_v51 = vpop.xlane.xlu0 %837  ;;  %v867_v53 = vadd.f32 %v848_v5, %v819_v29  ;;  %1608 = vlog2.f32 %v1205_v32  ;;  %v918_v32 = vld [vmem:[#allocation4 + $0x70] sm:$0xff]  ;;  %v1110_v29 = vmax.f32 %v2617_v18, 1.0 }
 0x2c4   :  { %v862_v14 = vadd.f32 %v838_v51, %v814_v61  ;;  %v1216_v6 = vmul.f32 0.6931472, %v1589_v4  ;;  %1610 = vlog2.f32 %v1196_v33  ;;  %v1591_v12 = vpop.eup %1590  ;;  %v2624_v4 = vld [vmem:[#allocation5 + $0x70] sm:$0xff]  ;;  %v2626_v51 = vld [vmem:[#allocation5 + $0x28] sm:$0xff] }
 0x2c5   :  { %884 = vst.msk [vmem:[#allocation3 + $0x60] sm:$0xff] %vm2826_vm3, %v867_v53  ;;  %v1593_v9 = vpop.eup %1592  ;;  %1612 = vrcp.f32 %v1105_v52  ;;  %v1150_v40 = vmul.f32 %v1591_v12, %v1134_v28  ;;  %v1204_v22 = vld [vmem:[#allocation3 + $0x48] sm:$0xff]  ;;  %v1206_v52 = vld [vmem:[#allocation3 + $0x58] sm:$0xff]  ;;  %v1104_v10 = vmax.f32 %v2626_v51, 1.0  ;;  %vm1276_vm3 = vcmp.gt.f32.partialorder %v2591_v50, 0.0 }
 0x2c6   :  { %879 = vst.msk [vmem:[#allocation3 + $0x38] sm:$0xff] %vm2827_vm11, %v862_v14  ;;  %v957_v35 = vpop.xlane.xlu1 %956  ;;  %v1245_v54 = vsub.f32 %v1181_v46, %v1216_v6  ;;  %1614 = vlog2.f32 %v1201_v0  ;;  %v812_v24 = vmul.f32 %v1593_v9, %v796_v13  ;;  %vm1281_vm11 = vcmp.gt.f32.partialorder %v2600_v20, 0.0 }
 0x2c7   :  { %v1595_v38 = vpop.eup %1594  ;;  %v854_v43 = vpop.xlane.xlu0 %853  ;;  %v978_v25 = vadd.f32 %v957_v35, %v914_v15  ;;  %1616 = vrcp.f32 %v1103_v56  ;;  %v1182_v23 = vsub.f32 %v1150_v40, %v1166_v19  ;;  %v1132_v56 = vld [vmem:[#allocation4 + $0x8] sm:$0xff]  ;;  %v2638_v19 = vld [vmem:[#allocation5 + $0x78] sm:$0xff] }
 0x2c8   :  { %v870_v55 = vadd.f32 %v854_v43, %v822_v11  ;;  %v1261_v30 = vmul.f32 -1.0, %v1245_v54  ;;  %v1212_v8 = vmul.f32 0.6931472, %v1595_v38  ;;  %v1597_v59 = vpop.eup %1596  ;;  %v1199_v48 = vld [vmem:[#allocation3 + $0x20] sm:$0xff]  ;;  %1618 = vrcp.f32 %v1111_v62  ;;  %v915_v43 = vld [vmem:[#allocation4 + $0x58] sm:$0xff] }
 0x2c9   :  { %994 = vst.msk [vmem:[#allocation4 + $0x50] sm:$0xff] %vm2828_vm1, %v978_v25  ;;  %1620 = vrcp.f32 %v1108_v26  ;;  %v820_v1 = vmul.f32 %v1597_v59, %v804_v31  ;;  %v1113_v11 = vmax.f32 %v2624_v4, 1.0  ;;  %v1173_v26 = vld [vmem:[#allocation2 + $0x50] sm:$0xff]  ;;  %vm1286_vm1 = vcmp.gt.f32.partialorder %v2617_v18, 0.0 }
 0x2ca   :  { %887 = vst.msk [vmem:[#allocation3 + $0x78] sm:$0xff] %vm2829_vm15, %v870_v55  ;;  %v1293_v27 = vsel %vm1277_vm10, %v1261_v30, 0.0  ;;  %v961_v17 = vpop.xlane.xlu1 %960  ;;  %v1243_v58 = vsub.f32 %v1179_v16, %v1212_v8  ;;  %1622 = vlog2.f32 %v1204_v22  ;;  %v1171_v16 = vld [vmem:[#allocation2 + $0x40] sm:$0xff]  ;;  %vm1279_vm10 = vcmp.gt.f32.partialorder %v2604_v63, 0.0 }
 0x2cb   :  { %v1599_v36 = vpop.eup %1598  ;;  %v834_v47 = vpop.xlane.xlu0 %833  ;;  %1319 = vperm.xlu1 %1507, %v1293_v27   ;;  %v980_v3 = vadd.f32 %v961_v17, %v916_v42  ;;  %1624 = vlog2.f32 %v1199_v48  ;;  %v2636_v42 = vld [vmem:[#allocation5 + $0x68] sm:$0xff]  ;;  %v1137_v27 = vld [vmem:[#allocation4 + $0x30] sm:$0xff]  ;;  %vm1284_vm15 = vcmp.gt.f32.partialorder %v2608_v49, 0.0 }
 0x2cc   :  { %v1601_v33 = vpop.eup %1600  ;;  %v860_v45 = vadd.f32 %v834_v47, %v812_v24  ;;  %v1259_v61 = vmul.f32 -1.0, %v1243_v58  ;;  %v1218_v5 = vmul.f32 0.6931472, %v1599_v36  ;;  %v1207_v6 = vld [vmem:[#allocation3 + $0x60] sm:$0xff]  ;;  %1626 = vrcp.f32 %v1106_v60  ;;  %v1209_v58 = vld [vmem:[#allocation3 + $0x70] sm:$0xff]  ;;  %v917_v60 = vld [vmem:[#allocation4 + $0x68] sm:$0xff] }
 0x2cd   :  { %v1603_v53 = vpop.eup %1602  ;;  %996 = vst.msk [vmem:[#allocation4 + $0x60] sm:$0xff] %vm2830_vm2, %v980_v3  ;;  %v1155_v46 = vmul.f32 %v1601_v33, %v1139_v37  ;;  %1628 = vlog2.f32 %v1206_v52  ;;  %v1202_v9 = vld [vmem:[#allocation3 + $0x38] sm:$0xff]  ;;  %v1164_v47 = vld [vmem:[#allocation2 + $0x8] sm:$0xff]  ;;  %vm1287_vm2 = vcmp.gt.f32.partialorder %v2606_v2, 0.0 }
 0x2ce   :  { %v1605_v39 = vpop.eup %1604  ;;  %877 = vst.msk [vmem:[#allocation3 + $0x28] sm:$0xff] %vm2831_vm9, %v860_v45  ;;  %v965_v41 = vpop.xlane.xlu1 %964  ;;  %v1291_v14 = vsel %vm1275_vm6, %v1259_v61, 0.0  ;;  %v1246_v15 = vsub.f32 %v1182_v23, %v1218_v5  ;;  %v1228_v62 = vmul.f32 0.6931472, %v1603_v53  ;;  %1630 = vrcp.f32 %v1110_v29 }
 0x2cf   :  { %v1607_v28 = vpop.eup %1606  ;;  %v850_v12 = vpop.xlane.xlu0 %849  ;;  %v982_v0 = vadd.f32 %v965_v41, %v918_v32  ;;  %1309 = vperm.xlu1 %1507, %v1291_v14   ;;  %1632 = vlog2.f32 %v1207_v6  ;;  %v1187_v55 = vsub.f32 %v1155_v46, %v1171_v16  ;;  %v1148_v30 = vmul.f32 %v1605_v39, %v1132_v56  ;;  %v1135_v14 = vld [vmem:[#allocation4 + $0x20] sm:$0xff]  ;;  %v919_v46 = vld [vmem:[#allocation4 + $0x78] sm:$0xff]  ;;  %v1140_v56 = vld [vmem:[#allocation4 + $0x48] sm:$0xff] }
 0x2d0   :  { %v1609_v35 = vpop.eup %1608  ;;  %v868_v13 = vadd.f32 %v850_v12, %v820_v1  ;;  %v1262_v54 = vmul.f32 -1.0, %v1246_v15  ;;  %v1141_v34 = vld [vmem:[#allocation4 + $0x50] sm:$0xff]  ;;  %1634 = vlog2.f32 %v1202_v9  ;;  %v1112_v32 = vmax.f32 %v2636_v42, 1.0 }
 0x2d1   :  { %v1611_v38 = vpop.eup %1610  ;;  %998 = vst.msk [vmem:[#allocation4 + $0x70] sm:$0xff] %vm2832_vm13, %v982_v0  ;;  %v1157_v25 = vmul.f32 %v1607_v28, %v1141_v34  ;;  %v1232_v59 = vmul.f32 0.6931472, %v1609_v35  ;;  %1636 = vrcp.f32 %v1113_v11  ;;  %v1251_v17 = vsub.f32 %v1187_v55, %v1228_v62  ;;  %v1169_v28 = vld [vmem:[#allocation2 + $0x30] sm:$0xff] }
 0x2d2   :  { %885 = vst.msk [vmem:[#allocation3 + $0x68] sm:$0xff] %vm2768_vm0, %v868_v13  ;;  %v1294_v40 = vsel %vm1278_vm14, %v1262_v54, 0.0  ;;  %v1613_v8 = vpop.eup %1612  ;;  %v1214_v31 = vmul.f32 0.6931472, %v1611_v38  ;;  %1638 = vrcp.f32 %v1104_v10  ;;  %v1180_v37 = vsub.f32 %v1148_v30, %v1164_v47  ;;  %v1210_v30 = vld [vmem:[#allocation3 + $0x78] sm:$0xff] }
 0x2d3   :  { %v959_v24 = vpop.xlane.xlu0 %958  ;;  %1324 = vperm.xlu1 %1507, %v1294_v40   ;;  %v1189_v22 = vsub.f32 %v1157_v25, %v1173_v26  ;;  %v1615_v48 = vpop.eup %1614  ;;  %v1153_v29 = vmul.f32 %v1613_v8, %v1137_v27  ;;  %v1114_v5 = vmax.f32 %v2638_v19, 1.0  ;;  %v1267_v1 = vmul.f32 -1.0, %v1251_v17  ;;  %v1138_v25 = vld [vmem:[#allocation4 + $0x38] sm:$0xff] }
 0x2d4   :  { %v979_v44 = vadd.f32 %v959_v24, %v915_v43  ;;  %v1617_v23 = vpop.eup %1616  ;;  %v1244_v39 = vsub.f32 %v1180_v37, %v1214_v31  ;;  %v1224_v41 = vmul.f32 0.6931472, %v1615_v48  ;;  %v1143_v43 = vld [vmem:[#allocation4 + $0x60] sm:$0xff]  ;;  %v1174_v17 = vld [vmem:[#allocation2 + $0x58] sm:$0xff]  ;;  %vm1282_vm6 = vcmp.gt.f32.partialorder %v2615_v7, 0.0 }
 0x2d5   :  { %v1253_v36 = vsub.f32 %v1189_v22, %v1232_v59  ;;  %v1200_v3 = vld [vmem:[#allocation3 + $0x28] sm:$0xff]  ;;  %v1619_v33 = vpop.eup %1618  ;;  %v1185_v57 = vsub.f32 %v1153_v29, %v1169_v28  ;;  %v1151_v10 = vmul.f32 %v1617_v23, %v1135_v14  ;;  %v1299_v34 = vsel %vm1283_vm12, %v1267_v1, 0.0  ;;  %v1167_v24 = vld [vmem:[#allocation2 + $0x20] sm:$0xff]  ;;  %v1170_v1 = vld [vmem:[#allocation2 + $0x38] sm:$0xff] }
 0x2d6   :  { %995 = vst.msk [vmem:[#allocation4 + $0x58] sm:$0xff] %vm2833_vm4, %v979_v44  ;;  %1640 = vlog2.f32 %v1200_v3  ;;  %v1621_v52 = vpop.eup %1620  ;;  %v1260_v62 = vmul.f32 -1.0, %v1244_v39  ;;  %v1172_v22 = vld [vmem:[#allocation2 + $0x48] sm:$0xff]  ;;  %vm1289_vm9 = vcmp.gt.f32.partialorder %v2624_v4, 0.0  ;;  %vm1280_vm13 = vcmp.gt.f32.partialorder %v2626_v51, 0.0 }
 0x2d7   :  { %v963_v45 = vpop.xlane.xlu0 %962  ;;  %v1269_v61 = vmul.f32 -1.0, %v1253_v36  ;;  %1642 = vlog2.f32 %v1209_v58  ;;  %v1623_v15 = vpop.eup %1622  ;;  %v1156_v35 = vmul.f32 %v1621_v52, %v1140_v56  ;;  %v1249_v38 = vsub.f32 %v1185_v57, %v1224_v41  ;;  %v1136_v39 = vld [vmem:[#allocation4 + $0x28] sm:$0xff] }
 0x2d8   :  { %v981_v53 = vadd.f32 %v963_v45, %v917_v60  ;;  %1644 = vrcp.f32 %v1112_v32  ;;  %v1625_v0 = vpop.eup %1624  ;;  %v1230_v55 = vmul.f32 0.6931472, %v1623_v15  ;;  %v1145_v27 = vld [vmem:[#allocation4 + $0x70] sm:$0xff]  ;;  %v1183_v58 = vsub.f32 %v1151_v10, %v1167_v24  ;;  %v1176_v24 = vld [vmem:[#allocation2 + $0x68] sm:$0xff] }
 0x2d9   :  { %v1301_v6 = vsel %vm1285_vm5, %v1269_v61, 0.0  ;;  %v1208_v12 = vld [vmem:[#allocation3 + $0x68] sm:$0xff]  ;;  %v1627_v9 = vpop.eup %1626  ;;  %v1220_v26 = vmul.f32 0.6931472, %v1625_v0  ;;  %v1188_v48 = vsub.f32 %v1156_v35, %v1172_v22  ;;  %v1159_v60 = vmul.f32 %v1619_v33, %v1143_v43 }
 0x2da   :  { %997 = vst.msk [vmem:[#allocation4 + $0x68] sm:$0xff] %vm2834_vm8, %v981_v53  ;;  %1359 = vperm.xlu0 %1506, %v1301_v6   ;;  %1646 = vlog2.f32 %v1208_v12  ;;  %v1629_v13 = vpop.eup %1628  ;;  %v1154_v59 = vmul.f32 %v1627_v9, %v1138_v25  ;;  %v1292_v47 = vsel %vm1276_vm3, %v1260_v62, 0.0  ;;  %v1265_v3 = vmul.f32 -1.0, %v1249_v38  ;;  %v1177_v6 = vld [vmem:[#allocation2 + $0x70] sm:$0xff] }
 0x2db   :  { %v967_v11 = vpop.xlane.xlu0 %966  ;;  %1648 = vrcp.f32 %v1114_v5  ;;  %v1631_v16 = vpop.eup %1630  ;;  %v1234_v31 = vmul.f32 0.6931472, %v1629_v13  ;;  %v1247_v37 = vsub.f32 %v1183_v58, %v1220_v26  ;;  %v1252_v29 = vsub.f32 %v1188_v48, %v1230_v55  ;;  %v1175_v5 = vld [vmem:[#allocation2 + $0x60] sm:$0xff] }
 0x2dc   :  { %v983_v54 = vadd.f32 %v967_v11, %v919_v46  ;;  %v1633_v8 = vpop.eup %1632  ;;  %1650 = vlog2.f32 %v1210_v30  ;;  %v1191_v33 = vsub.f32 %v1159_v60, %v1175_v5  ;;  %v1297_v14 = vsel %vm1281_vm11, %v1265_v3, 0.0 }
 0x2dd   :  { %v1142_v40 = vld [vmem:[#allocation4 + $0x58] sm:$0xff]  ;;  %v1635_v44 = vpop.eup %1634  ;;  %v1236_v50 = vmul.f32 0.6931472, %v1633_v8  ;;  %v1186_v46 = vsub.f32 %v1154_v59, %v1170_v1  ;;  %v1263_v12 = vmul.f32 -1.0, %v1247_v37  ;;  %v1268_v0 = vmul.f32 -1.0, %v1252_v29 }
 0x2de   :  { %999 = vst.msk [vmem:[#allocation4 + $0x78] sm:$0xff] %vm2835_vm7, %v983_v54  ;;  %1349 = vperm.xlu0 %1506, %v1299_v34   ;;  %v1158_v21 = vmul.f32 %v1631_v16, %v1142_v40  ;;  %v1637_v36 = vpop.eup %1636  ;;  %v1226_v52 = vmul.f32 0.6931472, %v1635_v44  ;;  %v1168_v34 = vld [vmem:[#allocation2 + $0x28] sm:$0xff]  ;;  %vm1288_vm14 = vcmp.gt.f32.partialorder %v2636_v42, 0.0  ;;  %vm1290_vm0 = vcmp.gt.f32.partialorder %v2638_v19, 0.0 }
 0x2df   :  { %v1639_v23 = vpop.eup %1638  ;;  %v1161_v45 = vmul.f32 %v1637_v36, %v1145_v27  ;;  %v1255_v57 = vsub.f32 %v1191_v33, %v1236_v50  ;;  %v1295_v16 = vsel %vm1279_vm10, %v1263_v12, 0.0  ;;  %v1300_v40 = vsel %vm1284_vm15, %v1268_v0, 0.0  ;;  %v1178_v27 = vld [vmem:[#allocation2 + $0x78] sm:$0xff] }
 0x2e0   :  { %v1190_v32 = vsub.f32 %v1158_v21, %v1174_v17  ;;  %v1152_v28 = vmul.f32 %v1639_v23, %v1136_v39  ;;  %v1250_v10 = vsub.f32 %v1186_v46, %v1226_v52 }
 0x2e1   :  { %v1193_v56 = vsub.f32 %v1161_v45, %v1177_v6  ;;  %v1144_v9 = vld [vmem:[#allocation4 + $0x68] sm:$0xff]  ;;  %v1271_v26 = vmul.f32 -1.0, %v1255_v57 }
 0x2e2   :  { %1314 = vperm.xlu0 %1506, %v1292_v47   ;;  %v1254_v61 = vsub.f32 %v1190_v32, %v1234_v31  ;;  %v1184_v43 = vsub.f32 %v1152_v28, %v1168_v34  ;;  %v1266_v18 = vmul.f32 -1.0, %v1250_v10 }
 0x2e3   :  { %v1641_v53 = vpop.eup %1640  ;;  %v1303_v63 = vsel %vm1287_vm2, %v1271_v26, 0.0 }
 0x2e4   :  { %v1643_v41 = vpop.eup %1642  ;;  %v1270_v15 = vmul.f32 -1.0, %v1254_v61  ;;  %v1222_v35 = vmul.f32 0.6931472, %v1641_v53  ;;  %v1298_v44 = vsel %vm1282_vm6, %v1266_v18, 0.0 }
 0x2e5   :  { %v1645_v11 = vpop.eup %1644  ;;  %v1240_v54 = vmul.f32 0.6931472, %v1643_v41  ;;  %v1146_v62 = vld [vmem:[#allocation4 + $0x78] sm:$0xff] }
 0x2e6   :  { %1339 = vperm.xlu0 %1506, %v1297_v14   ;;  %v1302_v20 = vsel %vm1286_vm1, %v1270_v15, 0.0  ;;  %v1160_v25 = vmul.f32 %v1645_v11, %v1144_v9  ;;  %v1248_v30 = vsub.f32 %v1184_v43, %v1222_v35 }
 0x2e7   :  { %v1647_v13 = vpop.eup %1646  ;;  %1364 = vperm.xlu1 %1507, %v1302_v20   ;;  %v1257_v55 = vsub.f32 %v1193_v56, %v1240_v54 }
 0x2e8   :  { %v1649_v38 = vpop.eup %1648  ;;  %v1238_v8 = vmul.f32 0.6931472, %v1647_v13  ;;  %v1192_v22 = vsub.f32 %v1160_v25, %v1176_v24  ;;  %v1264_v17 = vmul.f32 -1.0, %v1248_v30 }
 0x2e9   :  { %v1162_v21 = vmul.f32 %v1649_v38, %v1146_v62  ;;  %v1651_v59 = vpop.eup %1650  ;;  %v1273_v49 = vmul.f32 -1.0, %v1257_v55 }
 0x2ea   :  { %1329 = vperm.xlu0 %1506, %v1295_v16   ;;  %v1256_v31 = vsub.f32 %v1192_v22, %v1238_v8  ;;  %v1242_v48 = vmul.f32 0.6931472, %v1651_v59  ;;  %v1296_v2 = vsel %vm1280_vm13, %v1264_v17, 0.0 }
 0x2eb   :  { %1354 = vperm.xlu1 %1507, %v1300_v40   ;;  %v1194_v58 = vsub.f32 %v1162_v21, %v1178_v27  ;;  %v1305_v60 = vsel %vm1289_vm9, %v1273_v49, 0.0 }
 0x2ec   :  { %v1272_v36 = vmul.f32 -1.0, %v1256_v31 }
 0x2ed   :  { %v1258_v47 = vsub.f32 %v1194_v58, %v1242_v48 }
 0x2ee   :  { %1369 = vperm.xlu0 %1506, %v1303_v63   ;;  %v1304_v7 = vsel %vm1288_vm14, %v1272_v36, 0.0 }
 0x2ef   :  { %1344 = vperm.xlu1 %1507, %v1298_v44   ;;  %v1274_v3 = vmul.f32 -1.0, %v1258_v47 }
 0x2f1   :  { %v1306_v32 = vsel %vm1290_vm0, %v1274_v3, 0.0 }
 0x2f2   :  { %1379 = vperm.xlu0 %1506, %v1305_v60  }
 0x2f3   :  { %1334 = vperm.xlu1 %1507, %v1296_v2  }
 0x2f7   :  { %1374 = vperm.xlu1 %1507, %v1304_v7  }
 0x2fb   :  { %1384 = vperm.xlu1 %1507, %v1306_v32  }
 0x346   :  { %v1320_v23 = vpop.permute.xlu1 %1319 }
 0x347   :  { %1389 = vst [vmem:[#allocation6 + $0x10] sm:$0xff] %v1320_v23 }
 0x34a   :  { %v1310_v4 = vpop.permute.xlu1 %1309 }
 0x34b   :  { %1387 = vst [vmem:[#allocation6] sm:$0xff] %v1310_v4 }
 0x34e   :  { %v1325_v37 = vpop.permute.xlu1 %1324 }
 0x34f   :  { %1390 = vst [vmem:[#allocation6 + $0x18] sm:$0xff] %v1325_v37 }
 0x355   :  { %v1360_v51 = vpop.permute.xlu0 %1359 }
 0x356   :  { %1397 = vst [vmem:[#allocation6 + $0x50] sm:$0xff] %v1360_v51 }
 0x359   :  { %v1350_v29 = vpop.permute.xlu0 %1349 }
 0x35a   :  { %1395 = vst [vmem:[#allocation6 + $0x40] sm:$0xff] %v1350_v29 }
 0x35d   :  { %v1315_v50 = vpop.permute.xlu0 %1314 }
 0x35e   :  { %1388 = vst [vmem:[#allocation6 + $0x8] sm:$0xff] %v1315_v50 }
 0x361   :  { %v1340_v42 = vpop.permute.xlu0 %1339 }
 0x362   :  { %1393 = vst [vmem:[#allocation6 + $0x30] sm:$0xff] %v1340_v42  ;;  %v1365_v45 = vpop.permute.xlu1 %1364 }
 0x363   :  { %1398 = vst [vmem:[#allocation6 + $0x58] sm:$0xff] %v1365_v45 }
 0x365   :  { %v1330_v61 = vpop.permute.xlu0 %1329 }
 0x366   :  { %1391 = vst [vmem:[#allocation6 + $0x20] sm:$0xff] %v1330_v61  ;;  %v1355_v19 = vpop.permute.xlu1 %1354 }
 0x367   :  { %1396 = vst [vmem:[#allocation6 + $0x48] sm:$0xff] %v1355_v19 }
 0x369   :  { %v1370_v5 = vpop.permute.xlu0 %1369 }
 0x36a   :  { %1399 = vst [vmem:[#allocation6 + $0x60] sm:$0xff] %v1370_v5  ;;  %v1345_v52 = vpop.permute.xlu1 %1344 }
 0x36b   :  { %1394 = vst [vmem:[#allocation6 + $0x38] sm:$0xff] %v1345_v52 }
 0x36d   :  { %v1380_v53 = vpop.permute.xlu0 %1379 }
 0x36e   :  { %1401 = vst [vmem:[#allocation6 + $0x70] sm:$0xff] %v1380_v53  ;;  %v1335_v33 = vpop.permute.xlu1 %1334 }
 0x36f   :  { %1392 = vst [vmem:[#allocation6 + $0x28] sm:$0xff] %v1335_v33 }
 0x372   :  { %v1375_v1 = vpop.permute.xlu1 %1374 }
 0x373   :  { %1400 = vst [vmem:[#allocation6 + $0x68] sm:$0xff] %v1375_v1 }
 0x376   :  { %v1385_v39 = vpop.permute.xlu1 %1384 }
 0x377   :  { %1402 = vst [vmem:[#allocation6 + $0x78] sm:$0xff] %v1385_v39 }
 0x378   :  { %1663 = shalt.err (!%p1660_p4)
}
 0x379   :  { %s1678_s28 = smov 128   ;;  %s1679_s29 = smov 8  }
 0x37a   :  { %1414 = dma.vmem_to_hbm [thread:$0]  %s1409_s26, 2048, %s2667_s4, [#allocation7], %s1678_s28, %s1678_s28, %s1679_s29  }
 0x37b   :  { %1672 = dma.done.wait [#allocation7], 2048  }
 0x37c   :  { %1673 = vsyncadd [#allocation7], 4294965248 }
 0x37d   :  { %1418 = vsyncpa [#allocation7], 1 }

</bundles_post_ra>
